<compile_context>
chip_gen: v7x
topology: tpu7x:2x2x1
jax: 0.10.0
libtpu: 0.0.40
codegen_flags: <defaults>
</compile_context>

<pallas_src>
import jax
import jax.numpy as jnp
from jax.experimental import pallas as pl
from jax.experimental.pallas import tpu as pltpu

D_IN, D_H1, D_H2, D_OUT = 768, 768, 512, 128


def _round_up(x, m):
    return (x + m - 1) // m * m


def hash_module_kernel(x_ref, w1_ref, b1_ref, w2_ref, b2_ref, w3_ref, b3_ref,
                       o_ref):
    # fc1: bf16 operands, f32 accumulation on the MXU; bias add in f32 (VPU).
    h = jnp.dot(x_ref[...], w1_ref[...],
                preferred_element_type=jnp.float32) + b1_ref[...]
    # fc2
    h = jnp.dot(h.astype(jnp.bfloat16), w2_ref[...],
                preferred_element_type=jnp.float32) + b2_ref[...]
    # fc3 + tanh: keep the epilogue in f32 (tanh goes to the EUP slot).
    h = jnp.dot(h.astype(jnp.bfloat16), w3_ref[...],
                preferred_element_type=jnp.float32) + b3_ref[...]
    o_ref[...] = jnp.tanh(h).astype(o_ref.dtype)


def hash_encoder_forward(x, params, *, tile_m=512):
    """encode='hash' forward: tanh(fc3(fc2(fc1(x))))."""
    w1, b1, w2, b2, w3, b3 = params

    # Flatten arbitrary leading dims (torch.nn.Linear semantics).
    lead_shape = x.shape[:-1]
    assert x.shape[-1] == D_IN, f"expected last dim {D_IN}, got {x.shape[-1]}"
    x2 = x.reshape(-1, D_IN)
    B = x2.shape[0]

    # Batch tile: sublane-aligned (multiple of 8), clamped to the padded batch
    # so small test batches still run a single, right-sized grid step.
    tm = max(8, min(tile_m, _round_up(B, 8)))
    Bp = _round_up(B, tm)

    xb = x2.astype(jnp.bfloat16)
    if Bp != B:
        xb = jnp.pad(xb, ((0, Bp - B), (0, 0)))

    grid = (Bp // tm,)

    full = lambda shape: pl.BlockSpec(shape, lambda i: (0, 0))

    n_w_elems = D_IN * D_H1 + D_H1 * D_H2 + D_H2 * D_OUT
    cost = pl.CostEstimate(
        flops=2 * Bp * n_w_elems,
        transcendentals=Bp * D_OUT,
        bytes_accessed=int(
            Bp * D_IN * 2                      # x (bf16)
            + n_w_elems * 2                    # weights (bf16)
            + (D_H1 + D_H2 + D_OUT) * 4        # biases (f32)
            + Bp * D_OUT * 4),                 # output (f32)
    )

    out = pl.pallas_call(
        hash_module_kernel,
        out_shape=jax.ShapeDtypeStruct((Bp, D_OUT), jnp.float32),
        grid_spec=pltpu.PrefetchScalarGridSpec(
            num_scalar_prefetch=0,
            grid=grid,
            in_specs=[
                pl.BlockSpec((tm, D_IN), lambda i: (i, 0)),   # x tile (bf16)
                full((D_IN, D_H1)),                           # w1 (bf16)
                full((1, D_H1)),                              # b1 (f32)
                full((D_H1, D_H2)),                           # w2 (bf16)
                full((1, D_H2)),                              # b2 (f32)
                full((D_H2, D_OUT)),                          # w3 (bf16)
                full((1, D_OUT)),                             # b3 (f32)
            ],
            out_specs=pl.BlockSpec((tm, D_OUT), lambda i: (i, 0)),
        ),
        compiler_params=pltpu.CompilerParams(
            dimension_semantics=("parallel",),
            vmem_limit_bytes=32 * 1024 * 1024,
        ),
        cost_estimate=cost,
    )(xb, w1, b1, w2, b2, w3, b3)

    if Bp != B:
        out = out[:B]
    return out.reshape(*lead_shape, D_OUT)


def init_params(key):
    """Deterministic init mimicking PyTorch Linear default U[-1/sqrt(in), 1/sqrt(in)].

    Weights are stored as (in, out) = transpose of PyTorch's (out, in), in
    bfloat16 (MXU operand dtype); biases stay float32."""
    ks = jax.random.split(key, 6)

    def linear(kw, kb, d_in, d_out):
        bound = 1.0 / jnp.sqrt(float(d_in))
        w = jax.random.uniform(kw, (d_in, d_out), jnp.float32, -bound, bound)
        b = jax.random.uniform(kb, (1, d_out), jnp.float32, -bound, bound)
        return w.astype(jnp.bfloat16), b

    w1, b1 = linear(ks[0], ks[1], D_IN, D_H1)
    w2, b2 = linear(ks[2], ks[3], D_H1, D_H2)
    w3, b3 = linear(ks[4], ks[5], D_H2, D_OUT)
    return (w1, b1, w2, b2, w3, b3)


def reference_forward(x, params):
    """Pure-JAX reference following the same bf16-operand / f32-accumulate path."""
    w1, b1, w2, b2, w3, b3 = params
    h = jnp.dot(x.astype(jnp.bfloat16), w1,
                preferred_element_type=jnp.float32) + b1
    h = jnp.dot(h.astype(jnp.bfloat16), w2,
                preferred_element_type=jnp.float32) + b2
    h = jnp.dot(h.astype(jnp.bfloat16), w3,
                preferred_element_type=jnp.float32) + b3
    return jnp.tanh(h)


if __name__ == "__main__":
    key = jax.random.PRNGKey(0)
    k_x, k_p = jax.random.split(key)

    batch = 8
    x = jax.random.normal(k_x, (batch, D_IN), jnp.float32)
    params = init_params(k_p)

    out = hash_encoder_forward(x, params)
    out = jax.block_until_ready(out)

    ref = reference_forward(x, params)
    assert out.shape == (batch, D_OUT)
    assert jnp.allclose(out, ref, atol=1e-2, rtol=1e-2), "mismatch vs reference"

    print("KERNEL_OK")
</pallas_src>

<mosaic_0001>
module attributes {stable_mosaic.version = 11 : i64} {
  func.func @hash_module_kernel(%arg0: i32, %arg1: memref<8x768xbf16, #tpu.memory_space<vmem>>, %arg2: memref<768x768xbf16, #tpu.memory_space<vmem>>, %arg3: memref<1x768xf32, #tpu.memory_space<vmem>>, %arg4: memref<768x512xbf16, #tpu.memory_space<vmem>>, %arg5: memref<1x512xf32, #tpu.memory_space<vmem>>, %arg6: memref<512x128xbf16, #tpu.memory_space<vmem>>, %arg7: memref<1x128xf32, #tpu.memory_space<vmem>>, %arg8: memref<8x128xf32, #tpu.memory_space<vmem>>) attributes {dimension_semantics = [#tpu.dimension_semantics<parallel>], iteration_bounds = array<i64: 1>, scalar_prefetch = 0 : i64, scratch_operands = 0 : i64, tpu.core_type = #tpu.core_type<tc>, window_params = [{transform_indices = @transform_0, window_bounds = array<i64: 8, 768>}, {pipeline_mode = #tpu.pipeline_mode<synchronous>, transform_indices = @transform_1, window_bounds = array<i64: 768, 768>}, {pipeline_mode = #tpu.pipeline_mode<synchronous>, transform_indices = @transform_2, window_bounds = array<i64: 1, 768>}, {pipeline_mode = #tpu.pipeline_mode<synchronous>, transform_indices = @transform_3, window_bounds = array<i64: 768, 512>}, {pipeline_mode = #tpu.pipeline_mode<synchronous>, transform_indices = @transform_4, window_bounds = array<i64: 1, 512>}, {pipeline_mode = #tpu.pipeline_mode<synchronous>, transform_indices = @transform_5, window_bounds = array<i64: 512, 128>}, {pipeline_mode = #tpu.pipeline_mode<synchronous>, transform_indices = @transform_6, window_bounds = array<i64: 1, 128>}, {transform_indices = @transform_7, window_bounds = array<i64: 8, 128>}]} {
    %c0 = arith.constant 0 : index
    %c0_0 = arith.constant 0 : index
    %0 = vector.load %arg1[%c0, %c0_0] : memref<8x768xbf16, #tpu.memory_space<vmem>>, vector<8x768xbf16>
    %c0_1 = arith.constant 0 : index
    %c0_2 = arith.constant 0 : index
    %1 = vector.load %arg2[%c0_1, %c0_2] : memref<768x768xbf16, #tpu.memory_space<vmem>>, vector<768x768xbf16>
    %cst = arith.constant dense<0.000000e+00> : vector<8x768xf32>
    %2 = tpu.matmul %0, %1, %cst {dimension_numbers = #tpu.dot_dimension_numbers<[1], [0], [0], [1], [0, 0, 1, 1], [], []>} : vector<8x768xbf16>, vector<768x768xbf16>, vector<8x768xf32> -> vector<8x768xf32>
    %c0_3 = arith.constant 0 : index
    %c0_4 = arith.constant 0 : index
    %3 = vector.load %arg3[%c0_3, %c0_4] : memref<1x768xf32, #tpu.memory_space<vmem>>, vector<1x768xf32>
    %4 = vector.broadcast %3 : vector<1x768xf32> to vector<8x768xf32>
    %5 = arith.addf %2, %4 : vector<8x768xf32>
    %6 = arith.truncf %5 : vector<8x768xf32> to vector<8x768xbf16>
    %c0_5 = arith.constant 0 : index
    %c0_6 = arith.constant 0 : index
    %7 = vector.load %arg4[%c0_5, %c0_6] : memref<768x512xbf16, #tpu.memory_space<vmem>>, vector<768x512xbf16>
    %cst_7 = arith.constant dense<0.000000e+00> : vector<8x512xf32>
    %8 = tpu.matmul %6, %7, %cst_7 {dimension_numbers = #tpu.dot_dimension_numbers<[1], [0], [0], [1], [0, 0, 1, 1], [], []>} : vector<8x768xbf16>, vector<768x512xbf16>, vector<8x512xf32> -> vector<8x512xf32>
    %c0_8 = arith.constant 0 : index
    %c0_9 = arith.constant 0 : index
    %9 = vector.load %arg5[%c0_8, %c0_9] : memref<1x512xf32, #tpu.memory_space<vmem>>, vector<1x512xf32>
    %10 = vector.broadcast %9 : vector<1x512xf32> to vector<8x512xf32>
    %11 = arith.addf %8, %10 : vector<8x512xf32>
    %12 = arith.truncf %11 : vector<8x512xf32> to vector<8x512xbf16>
    %c0_10 = arith.constant 0 : index
    %c0_11 = arith.constant 0 : index
    %13 = vector.load %arg6[%c0_10, %c0_11] : memref<512x128xbf16, #tpu.memory_space<vmem>>, vector<512x128xbf16>
    %cst_12 = arith.constant dense<0.000000e+00> : vector<8x128xf32>
    %14 = tpu.matmul %12, %13, %cst_12 {dimension_numbers = #tpu.dot_dimension_numbers<[1], [0], [0], [1], [0, 0, 1, 1], [], []>} : vector<8x512xbf16>, vector<512x128xbf16>, vector<8x128xf32> -> vector<8x128xf32>
    %c0_13 = arith.constant 0 : index
    %c0_14 = arith.constant 0 : index
    %15 = vector.load %arg7[%c0_13, %c0_14] : memref<1x128xf32, #tpu.memory_space<vmem>>, vector<1x128xf32>
    %16 = vector.broadcast %15 : vector<1x128xf32> to vector<8x128xf32>
    %17 = arith.addf %14, %16 : vector<8x128xf32>
    %18 = math.tanh %17 : vector<8x128xf32>
    %c0_15 = arith.constant 0 : index
    %c0_16 = arith.constant 0 : index
    %19 = vector.load %arg8[%c0_15, %c0_16] : memref<8x128xf32, #tpu.memory_space<vmem>>, vector<8x128xf32>
    tpu.vector_store %arg8[%c0_15, %c0_16], %18 {strides = array<i32>} : memref<8x128xf32, #tpu.memory_space<vmem>>, vector<8x128xf32>,
    return
  }
  func.func @transform_0(%arg0: i32) -> (i32, i32) {
    %c0_i32 = arith.constant 0 : i32
    %c0_i32_0 = arith.constant 0 : i32
    return %arg0, %c0_i32 : i32, i32
  }
  func.func @transform_1(%arg0: i32) -> (i32, i32) {
    %c0_i32 = arith.constant 0 : i32
    %c0_i32_0 = arith.constant 0 : i32
    %c0_i32_1 = arith.constant 0 : i32
    return %c0_i32, %c0_i32_0 : i32, i32
  }
  func.func @transform_2(%arg0: i32) -> (i32, i32) {
    %c0_i32 = arith.constant 0 : i32
    %c0_i32_0 = arith.constant 0 : i32
    %c0_i32_1 = arith.constant 0 : i32
    return %c0_i32, %c0_i32_0 : i32, i32
  }
  func.func @transform_3(%arg0: i32) -> (i32, i32) {
    %c0_i32 = arith.constant 0 : i32
    %c0_i32_0 = arith.constant 0 : i32
    %c0_i32_1 = arith.constant 0 : i32
    return %c0_i32, %c0_i32_0 : i32, i32
  }
  func.func @transform_4(%arg0: i32) -> (i32, i32) {
    %c0_i32 = arith.constant 0 : i32
    %c0_i32_0 = arith.constant 0 : i32
    %c0_i32_1 = arith.constant 0 : i32
    return %c0_i32, %c0_i32_0 : i32, i32
  }
  func.func @transform_5(%arg0: i32) -> (i32, i32) {
    %c0_i32 = arith.constant 0 : i32
    %c0_i32_0 = arith.constant 0 : i32
    %c0_i32_1 = arith.constant 0 : i32
    return %c0_i32, %c0_i32_0 : i32, i32
  }
  func.func @transform_6(%arg0: i32) -> (i32, i32) {
    %c0_i32 = arith.constant 0 : i32
    %c0_i32_0 = arith.constant 0 : i32
    %c0_i32_1 = arith.constant 0 : i32
    return %c0_i32, %c0_i32_0 : i32, i32
  }
  func.func @transform_7(%arg0: i32) -> (i32, i32) {
    %c0_i32 = arith.constant 0 : i32
    %c0_i32_0 = arith.constant 0 : i32
    return %arg0, %c0_i32 : i32, i32
  }
}

</mosaic_0001>

<bundles_post_ra>
// kernel: tpu_custom_call.1
= control target key start
LH: loop header
LB: loop body
LE: loop exit
PB: predicated region body
PF: predicated region fallthrough
CT: control target
= control target key end

     0   :  { %12 = vsyncpa [#allocation3], 0  ;;  %s5860_s0 = inlined_call_operand.hbm [shape: bf16[8,768], index: 0, kind: input, shape index: {}]   ;;  %s5861_s1 = inlined_call_operand.hbm [shape: bf16[768,768], index: 1, kind: input, shape index: {}]   ;;  %s5862_s2 = inlined_call_operand.hbm [shape: f32[1,768], index: 2, kind: input, shape index: {}]   ;;  %s5863_s3 = inlined_call_operand.hbm [shape: bf16[768,512], index: 3, kind: input, shape index: {}]   ;;  %s5864_s4 = inlined_call_operand.hbm [shape: f32[1,512], index: 4, kind: input, shape index: {}]   ;;  %s5865_s5 = inlined_call_operand.hbm [shape: bf16[512,128], index: 5, kind: input, shape index: {}]   ;;  %s5866_s6 = inlined_call_operand.hbm [shape: f32[1,128], index: 6, kind: input, shape index: {}]   ;;  %s5867_s7 = inlined_call_operand.hbm [shape: f32[8,128], index: 7, kind: output, shape index: {}]  }
   0x1   :  { %13 = vsyncpa [#allocation6], 0 }
   0x2   :  { %14 = vsyncpa [#allocation9], 0 }
   0x3   :  { %15 = vsyncpa [#allocation12], 0 }
   0x4   :  { %16 = vsyncpa [#allocation4], 0  ;;  %s5632_s24 = smov [#allocation5]   ;;  %s5446_s28 = scalar_lea.hbm %s5861_s1, 36864 }
   0x5   :  { %s32_s25 = sshll.u32 %s5632_s24, 4  ;;  %p5447_p0 = scmp.ne.s32.totalorder %s5861_s1, %s5446_s28  ;;  %s33_s25 = int_to_ptr.vmem [resolvable:$true] %s32_s25 }
   0x6   :  { %p5450_p1 = scmp.lt.u32.totalorder %s5446_s28, %s5861_s1 }
   0x8   :  { %p5452_p2 = pnand %p5450_p1, %p5447_p0 }
   0xa   :  { %5455 = shalt.err (!%p5452_p2)
}
   0xb   :  { %s5456_s10 = scalar_lea.vmem %s33_s25, 36864  ;;  %p5461_p4 = scmp.lt.s32.totalorder %s33_s25, %s33_s25 }
   0xc   :  { %p5457_p3 = scmp.ne.s32.totalorder %s33_s25, %s5456_s10  ;;  %p5462_p5 = scmp.lt.s32.totalorder %s5456_s10, %s5456_s10 }
   0xe   :  { %p5463_p6 = por %p5462_p5, %p5461_p4 }
  0x10   :  { %p5464_p7 = pnand %p5463_p6, %p5457_p3 }
  0x12   :  { %5467 = shalt.err (!%p5464_p7)
}
  0x13   :  { %s5633_s11 = smov 384   ;;  %s5634_s12 = smov 24  }
  0x14   :  { %38 = dma.hbm_to_vmem [thread:$0]  %s5861_s1, 36864, %s33_s25, [#allocation6], %s5633_s11, %s5633_s11, %s5634_s12  }
  0x15   :  { %s5635_s15 = smov [#allocation8]   ;;  %s5468_s19 = scalar_lea.hbm %s5863_s3, 24576 }
  0x16   :  { %s54_s16 = sshll.u32 %s5635_s15, 4  ;;  %p5469_p8 = scmp.ne.s32.totalorder %s5863_s3, %s5468_s19  ;;  %s55_s16 = int_to_ptr.vmem [resolvable:$true] %s54_s16 }
  0x17   :  { %p5472_p9 = scmp.lt.u32.totalorder %s5468_s19, %s5863_s3 }
  0x19   :  { %p5474_p10 = pnand %p5472_p9, %p5469_p8 }
  0x1b   :  { %5477 = shalt.err (!%p5474_p10)
}
  0x1c   :  { %s5478_s24 = scalar_lea.vmem %s55_s16, 24576  ;;  %p5483_p12 = scmp.lt.s32.totalorder %s55_s16, %s55_s16 }
  0x1d   :  { %p5479_p11 = scmp.ne.s32.totalorder %s55_s16, %s5478_s24  ;;  %p5484_p13 = scmp.lt.s32.totalorder %s5478_s24, %s5478_s24 }
  0x1f   :  { %p5485_p0 = por %p5484_p13, %p5483_p12 }
  0x21   :  { %p5486_p1 = pnand %p5485_p0, %p5479_p11 }
  0x23   :  { %5489 = shalt.err (!%p5486_p1)
}
  0x24   :  { %s5636_s1 = smov 256   ;;  %s5637_s25 = smov 16  }
  0x25   :  { %60 = dma.hbm_to_vmem [thread:$0]  %s5863_s3, 24576, %s55_s16, [#allocation9], %s5636_s1, %s5636_s1, %s5637_s25  }
  0x26   :  { %s5638_s28 = smov [#allocation11]   ;;  %s5490_s9 = scalar_lea.hbm %s5865_s5, 4096 }
  0x27   :  { %s76_s29 = sshll.u32 %s5638_s28, 4  ;;  %p5491_p2 = scmp.ne.s32.totalorder %s5865_s5, %s5490_s9  ;;  %s77_s29 = int_to_ptr.vmem [resolvable:$true] %s76_s29 }
  0x28   :  { %p5494_p3 = scmp.lt.u32.totalorder %s5490_s9, %s5865_s5 }
  0x2a   :  { %p5496_p4 = pnand %p5494_p3, %p5491_p2 }
  0x2c   :  { %5499 = shalt.err (!%p5496_p4)
}
  0x2d   :  { %s5500_s14 = scalar_lea.vmem %s77_s29, 4096  ;;  %p5505_p6 = scmp.lt.s32.totalorder %s77_s29, %s77_s29 }
  0x2e   :  { %p5501_p5 = scmp.ne.s32.totalorder %s77_s29, %s5500_s14  ;;  %p5506_p7 = scmp.lt.s32.totalorder %s5500_s14, %s5500_s14 }
  0x30   :  { %p5507_p8 = por %p5506_p7, %p5505_p6 }
  0x32   :  { %p5508_p9 = pnand %p5507_p8, %p5501_p5 }
  0x34   :  { %5511 = shalt.err (!%p5508_p9)
}
  0x35   :  { %s5639_s3 = smov 64   ;;  %s5640_s15 = smov 4  }
  0x36   :  { %82 = dma.hbm_to_vmem [thread:$0]  %s5865_s5, 4096, %s77_s29, [#allocation12], %s5639_s3, %s5639_s3, %s5640_s15  }
  0x37   :  { %s5641_s18 = smov [#allocation2]   ;;  %s5642_s20 = smov [#allocation7]  }
  0x38   :  { %s23_s19 = sshll.u32 %s5641_s18, 4  ;;  %s45_s21 = sshll.u32 %s5642_s20, 4  ;;  %s24_s19 = int_to_ptr.vmem [resolvable:$true] %s23_s19  ;;  %s46_s21 = int_to_ptr.vmem [resolvable:$true] %s45_s21 }
  0x39   :  { %s5512_s24 = scalar_lea.hbm %s5860_s0, 384 }
  0x3a   :  { %p5513_p10 = scmp.ne.s32.totalorder %s5860_s0, %s5512_s24  ;;  %p5516_p11 = scmp.lt.u32.totalorder %s5512_s24, %s5860_s0 }
  0x3c   :  { %p5518_p12 = pnand %p5516_p11, %p5513_p10 }
  0x3e   :  { %5521 = shalt.err (!%p5518_p12)
}
  0x3f   :  { %s5522_s5 = scalar_lea.vmem %s24_s19, 384  ;;  %p5527_p0 = scmp.lt.s32.totalorder %s24_s19, %s24_s19 }
  0x40   :  { %p5523_p13 = scmp.ne.s32.totalorder %s24_s19, %s5522_s5  ;;  %p5528_p1 = scmp.lt.s32.totalorder %s5522_s5, %s5522_s5 }
  0x42   :  { %p5529_p2 = por %p5528_p1, %p5527_p0 }
  0x44   :  { %p5530_p3 = pnand %p5529_p2, %p5523_p13 }
  0x46   :  { %5533 = shalt.err (!%p5530_p3)
}
  0x47   :  { %26 = dma.hbm_to_vmem [thread:$0]  %s5860_s0, 384, %s24_s19, [#allocation3]  }
  0x48   :  { %s5534_s9 = scalar_lea.hbm %s5862_s2, 96 }
  0x49   :  { %p5535_p4 = scmp.ne.s32.totalorder %s5862_s2, %s5534_s9  ;;  %p5538_p5 = scmp.lt.u32.totalorder %s5534_s9, %s5862_s2 }
  0x4b   :  { %p5540_p6 = pnand %p5538_p5, %p5535_p4 }
  0x4d   :  { %5543 = shalt.err (!%p5540_p6)
}
  0x4e   :  { %s5544_s14 = scalar_lea.vmem %s46_s21, 96  ;;  %p5549_p8 = scmp.lt.s32.totalorder %s46_s21, %s46_s21 }
  0x4f   :  { %p5545_p7 = scmp.ne.s32.totalorder %s46_s21, %s5544_s14  ;;  %p5550_p9 = scmp.lt.s32.totalorder %s5544_s14, %s5544_s14 }
  0x51   :  { %p5551_p10 = por %p5550_p9, %p5549_p8 }
  0x53   :  { %p5552_p11 = pnand %p5551_p10, %p5545_p7 }
  0x55   :  { %5555 = shalt.err (!%p5552_p11)
}
  0x56   :  { %48 = dma.hbm_to_vmem [thread:$0]  %s5862_s2, 96, %s46_s21, [#allocation6]  }
  0x57   :  { %s5643_s15 = smov [#allocation10]   ;;  %s5644_s17 = smov [#allocation13]  }
  0x58   :  { %s67_s16 = sshll.u32 %s5643_s15, 4  ;;  %s89_s18 = sshll.u32 %s5644_s17, 4  ;;  %s68_s16 = int_to_ptr.vmem [resolvable:$true] %s67_s16  ;;  %s90_s18 = int_to_ptr.vmem [resolvable:$true] %s89_s18 }
  0x59   :  { %s5556_s22 = scalar_lea.hbm %s5864_s4, 64 }
  0x5a   :  { %p5557_p12 = scmp.ne.s32.totalorder %s5864_s4, %s5556_s22  ;;  %p5560_p13 = scmp.lt.u32.totalorder %s5556_s22, %s5864_s4 }
  0x5c   :  { %p5562_p0 = pnand %p5560_p13, %p5557_p12 }
  0x5e   :  { %5565 = shalt.err (!%p5562_p0)
}
  0x5f   :  { %s5566_s2 = scalar_lea.vmem %s68_s16, 64  ;;  %p5571_p2 = scmp.lt.s32.totalorder %s68_s16, %s68_s16 }
  0x60   :  { %p5567_p1 = scmp.ne.s32.totalorder %s68_s16, %s5566_s2  ;;  %p5572_p3 = scmp.lt.s32.totalorder %s5566_s2, %s5566_s2 }
  0x62   :  { %p5573_p4 = por %p5572_p3, %p5571_p2 }
  0x64   :  { %p5574_p5 = pnand %p5573_p4, %p5567_p1 }
  0x66   :  { %5577 = shalt.err (!%p5574_p5)
}
  0x67   :  { %70 = dma.hbm_to_vmem [thread:$0]  %s5864_s4, 64, %s68_s16, [#allocation9]  }
  0x68   :  { %s5578_s28 = scalar_lea.hbm %s5866_s6, 16 }
  0x69   :  { %p5579_p6 = scmp.ne.s32.totalorder %s5866_s6, %s5578_s28  ;;  %p5582_p7 = scmp.lt.u32.totalorder %s5578_s28, %s5866_s6 }
  0x6b   :  { %p5584_p8 = pnand %p5582_p7, %p5579_p6 }
  0x6d   :  { %5587 = shalt.err (!%p5584_p8)
}
  0x6e   :  { %s5588_s10 = scalar_lea.vmem %s90_s18, 16  ;;  %s5592_s11 = scalar_lea.vmem %s90_s18, 32 }
  0x6f   :  { %p5589_p9 = scmp.ne.s32.totalorder %s90_s18, %s5588_s10  ;;  %p5593_p10 = scmp.lt.s32.totalorder %s90_s18, %s90_s18 }
  0x70   :  { %p5594_p11 = scmp.lt.s32.totalorder %s5592_s11, %s5588_s10 }
  0x72   :  { %p5595_p12 = por %p5594_p11, %p5593_p10 }
  0x74   :  { %p5596_p13 = pnand %p5595_p12, %p5589_p9 }
  0x76   :  { %5599 = shalt.err (!%p5596_p13)
}
  0x77   :  { %92 = dma.hbm_to_vmem [thread:$0]  %s5866_s6, 16, %s90_s18, [#allocation12]  }
  0x78   :  { %5622 = dma.done.wait [#allocation3], 384  }
  0x79   :  { %5623 = vsyncadd [#allocation3], 4294966912 }
  0x7a   :  { %5624 = dma.done.wait [#allocation6], 36960  }
  0x7b   :  { %5625 = vsyncadd [#allocation6], 4294930336 }
  0x7c   :  { %5626 = dma.done.wait [#allocation9], 24640  }
  0x7d   :  { %5627 = vsyncadd [#allocation9], 4294942656 }
  0x7e   :  { %5628 = dma.done.wait [#allocation12], 4112  }
  0x7f   :  { %5629 = vsyncadd [#allocation12], 4294963184  ;;  %v4686_v0 = vld [vmem:[#allocation5 + $0x4] ss:$24 sps:$4 sm:$0xff]   ;;  %v4690_v2 = vld [vmem:[#allocation5] ss:$24 sps:$4 sm:$0xff]  }
  0x80   :  { %v4688_v1 = vld [vmem:[#allocation5 + $0x304] ss:$24 sps:$4 sm:$0xff]   ;;  %1899 = vmatprep.subr.bf16.mxu1 %v4686_v0  ;;  %v4691_v3 = vld [vmem:[#allocation5 + $0x300] ss:$24 sps:$4 sm:$0xff]   ;;  %v4692_v4 = vld [vmem:[#allocation5 + $0x34] ss:$24 sps:$4 sm:$0xff]  }
  0x81   :  { %1940 = vmatprep.subr.bf16.mxu0 %v4688_v1  ;;  %1900 = vmatpush1.bf16.msra.mxu1 %v4690_v2  ;;  %v4694_v5 = vld [vmem:[#allocation5 + $0x334] ss:$24 sps:$4 sm:$0xff]   ;;  %v4696_v6 = vld [vmem:[#allocation5 + $0x30] ss:$24 sps:$4 sm:$0xff]   ;;  %v4698_v8 = vld [vmem:[#allocation5 + $0x64] ss:$24 sps:$4 sm:$0xff]  }
  0x82   :  { %1941 = vmatpush1.bf16.msra.mxu0 %v4691_v3  ;;  %1901 = vmatprep.subr.bf16.mxu1 %v4692_v4  ;;  %v4697_v7 = vld [vmem:[#allocation5 + $0x330] ss:$24 sps:$4 sm:$0xff]   ;;  %v4700_v9 = vld [vmem:[#allocation5 + $0x364] ss:$24 sps:$4 sm:$0xff]   ;;  %v4702_v10 = vld [vmem:[#allocation5 + $0x60] ss:$24 sps:$4 sm:$0xff]  }
  0x83   :  { %1942 = vmatprep.subr.bf16.mxu0 %v4694_v5  ;;  %v4703_v11 = vld [vmem:[#allocation5 + $0x360] ss:$24 sps:$4 sm:$0xff]   ;;  %v4704_v12 = vld [vmem:[#allocation5 + $0x94] ss:$24 sps:$4 sm:$0xff]   ;;  %v4708_v14 = vld [vmem:[#allocation5 + $0x90] ss:$24 sps:$4 sm:$0xff]  }
  0x84   :  { %v4706_v13 = vld [vmem:[#allocation5 + $0x394] ss:$24 sps:$4 sm:$0xff]   ;;  %v4709_v15 = vld [vmem:[#allocation5 + $0x390] ss:$24 sps:$4 sm:$0xff]   ;;  %v4710_v16 = vld [vmem:[#allocation5 + $0xc4] ss:$24 sps:$4 sm:$0xff]  }
  0x85   :  { %1902 = vmatpush1.bf16.msra.mxu1 %v4696_v6  ;;  %v4712_v17 = vld [vmem:[#allocation5 + $0x3c4] ss:$24 sps:$4 sm:$0xff]   ;;  %v4714_v18 = vld [vmem:[#allocation5 + $0xc0] ss:$24 sps:$4 sm:$0xff]   ;;  %v4716_v20 = vld [vmem:[#allocation5 + $0xf4] ss:$24 sps:$4 sm:$0xff]  }
  0x86   :  { %1943 = vmatpush1.bf16.msra.mxu0 %v4697_v7  ;;  %1903 = vmatprep.subr.bf16.mxu1 %v4698_v8  ;;  %v4715_v19 = vld [vmem:[#allocation5 + $0x3c0] ss:$24 sps:$4 sm:$0xff]   ;;  %v4718_v21 = vld [vmem:[#allocation5 + $0x3f4] ss:$24 sps:$4 sm:$0xff]   ;;  %v4720_v22 = vld [vmem:[#allocation5 + $0xf0] ss:$24 sps:$4 sm:$0xff]  }
  0x87   :  { %1944 = vmatprep.subr.bf16.mxu0 %v4700_v9  ;;  %v4721_v23 = vld [vmem:[#allocation5 + $0x3f0] ss:$24 sps:$4 sm:$0xff]   ;;  %v4722_v24 = vld [vmem:[#allocation5 + $0x124] ss:$24 sps:$4 sm:$0xff]   ;;  %v4726_v26 = vld [vmem:[#allocation5 + $0x120] ss:$24 sps:$4 sm:$0xff]  }
  0x88   :  { %v4724_v25 = vld [vmem:[#allocation5 + $0x424] ss:$24 sps:$4 sm:$0xff]   ;;  %v4727_v27 = vld [vmem:[#allocation5 + $0x420] ss:$24 sps:$4 sm:$0xff]   ;;  %v4728_v28 = vld [vmem:[#allocation5 + $0x154] ss:$24 sps:$4 sm:$0xff]  }
  0x89   :  { %1904 = vmatpush1.bf16.msra.mxu1 %v4702_v10  ;;  %v4730_v29 = vld [vmem:[#allocation5 + $0x454] ss:$24 sps:$4 sm:$0xff]   ;;  %v4732_v30 = vld [vmem:[#allocation5 + $0x150] ss:$24 sps:$4 sm:$0xff]   ;;  %v4734_v32 = vld [vmem:[#allocation5 + $0x184] ss:$24 sps:$4 sm:$0xff]  }
  0x8a   :  { %1945 = vmatpush1.bf16.msra.mxu0 %v4703_v11  ;;  %1905 = vmatprep.subr.bf16.mxu1 %v4704_v12  ;;  %v4733_v31 = vld [vmem:[#allocation5 + $0x450] ss:$24 sps:$4 sm:$0xff]   ;;  %v4736_v33 = vld [vmem:[#allocation5 + $0x484] ss:$24 sps:$4 sm:$0xff]   ;;  %v4738_v34 = vld [vmem:[#allocation5 + $0x180] ss:$24 sps:$4 sm:$0xff]  }
  0x8b   :  { %1946 = vmatprep.subr.bf16.mxu0 %v4706_v13  ;;  %v4739_v35 = vld [vmem:[#allocation5 + $0x480] ss:$24 sps:$4 sm:$0xff]   ;;  %v4740_v36 = vld [vmem:[#allocation5 + $0x1b4] ss:$24 sps:$4 sm:$0xff]   ;;  %v4744_v38 = vld [vmem:[#allocation5 + $0x1b0] ss:$24 sps:$4 sm:$0xff]  }
  0x8c   :  { %v4742_v37 = vld [vmem:[#allocation5 + $0x4b4] ss:$24 sps:$4 sm:$0xff]   ;;  %v4745_v39 = vld [vmem:[#allocation5 + $0x4b0] ss:$24 sps:$4 sm:$0xff]   ;;  %v4746_v40 = vld [vmem:[#allocation5 + $0x1e4] ss:$24 sps:$4 sm:$0xff]  }
  0x8d   :  { %1906 = vmatpush1.bf16.msra.mxu1 %v4708_v14  ;;  %v4748_v41 = vld [vmem:[#allocation5 + $0x4e4] ss:$24 sps:$4 sm:$0xff]   ;;  %v4750_v42 = vld [vmem:[#allocation5 + $0x1e0] ss:$24 sps:$4 sm:$0xff]   ;;  %v4752_v44 = vld [vmem:[#allocation5 + $0x214] ss:$24 sps:$4 sm:$0xff]  }
  0x8e   :  { %1947 = vmatpush1.bf16.msra.mxu0 %v4709_v15  ;;  %1907 = vmatprep.subr.bf16.mxu1 %v4710_v16  ;;  %v4751_v43 = vld [vmem:[#allocation5 + $0x4e0] ss:$24 sps:$4 sm:$0xff]   ;;  %v4754_v45 = vld [vmem:[#allocation5 + $0x514] ss:$24 sps:$4 sm:$0xff]   ;;  %v4756_v49 = vld [vmem:[#allocation5 + $0x210] ss:$24 sps:$4 sm:$0xff]  }
  0x8f   :  { %1948 = vmatprep.subr.bf16.mxu0 %v4712_v17  ;;  %v115_v46 = vld [vmem:[#allocation2] sm:$0xff]  ;;  %v116_v48 = vld [vmem:[#allocation2 + $0x8] sm:$0xff]  ;;  %v4758_v52 = vld [vmem:[#allocation5 + $0x244] ss:$24 sps:$4 sm:$0xff]   ;;  %s5645_s6 = smov [#allocation14]  }
  0x90   :  { %v5770_v47 = vcombine.high %v115_v46, %v115_v46  ;;  %v4757_v50 = vld [vmem:[#allocation5 + $0x510] ss:$24 sps:$4 sm:$0xff]   ;;  %v5772_v51 = vcombine.high %v116_v48, %v116_v48  ;;  %v4760_v53 = vld [vmem:[#allocation5 + $0x544] ss:$24 sps:$4 sm:$0xff]   ;;  %v4762_v54 = vld [vmem:[#allocation5 + $0x240] ss:$24 sps:$4 sm:$0xff]   ;;  %v5776_v6 = vcombine.low %v115_v46, %v115_v46  ;;  %v5778_v7 = vcombine.low %v116_v48, %v116_v48 }
  0x91   :  { %1908 = vmatpush1.bf16.msra.mxu1 %v4714_v18  ;;  %v4763_v55 = vld [vmem:[#allocation5 + $0x540] ss:$24 sps:$4 sm:$0xff]   ;;  %v4764_v56 = vld [vmem:[#allocation5 + $0x274] ss:$24 sps:$4 sm:$0xff]   ;;  %v4768_v58 = vld [vmem:[#allocation5 + $0x270] ss:$24 sps:$4 sm:$0xff]  }
  0x92   :  { %1949 = vmatpush1.bf16.msra.mxu0 %v4715_v19  ;;  %1909 = vmatprep.subr.bf16.mxu1 %v4716_v20  ;;  %v4766_v57 = vld [vmem:[#allocation5 + $0x574] ss:$24 sps:$4 sm:$0xff]   ;;  %v4769_v59 = vld [vmem:[#allocation5 + $0x570] ss:$24 sps:$4 sm:$0xff]   ;;  %v4770_v60 = vld [vmem:[#allocation5 + $0x2a4] ss:$24 sps:$4 sm:$0xff]  }
  0x93   :  { %1950 = vmatprep.subr.bf16.mxu0 %v4718_v21  ;;  %1931 = vmatprep.mubr.bf16.mxu1 %v5770_v47  ;;  %v4772_v61 = vld [vmem:[#allocation5 + $0x5a4] ss:$24 sps:$4 sm:$0xff]   ;;  %v4774_v62 = vld [vmem:[#allocation5 + $0x2a0] ss:$24 sps:$4 sm:$0xff]   ;;  %v4776_v0 = vld [vmem:[#allocation5 + $0x2d4] ss:$24 sps:$4 sm:$0xff]  }
  0x94   :  { %1972 = vmatprep.mubr.bf16.mxu0 %v5772_v51  ;;  %v4775_v63 = vld [vmem:[#allocation5 + $0x5a0] ss:$24 sps:$4 sm:$0xff]   ;;  %v4778_v1 = vld [vmem:[#allocation5 + $0x5d4] ss:$24 sps:$4 sm:$0xff]   ;;  %v4780_v2 = vld [vmem:[#allocation5 + $0x2d0] ss:$24 sps:$4 sm:$0xff]  }
  0x95   :  { %1910 = vmatpush1.bf16.msra.mxu1 %v4720_v22  ;;  %v4781_v3 = vld [vmem:[#allocation5 + $0x5d0] ss:$24 sps:$4 sm:$0xff]   ;;  %v4787_v4 = vld [vmem:[#allocation5 + $0x604] ss:$24 sps:$4 sm:$0xff]   ;;  %v4785_v8 = vld [vmem:[#allocation5 + $0x600] ss:$24 sps:$4 sm:$0xff]  }
  0x96   :  { %1951 = vmatpush1.bf16.msra.mxu0 %v4721_v23  ;;  %1911 = vmatprep.subr.bf16.mxu1 %v4722_v24  ;;  %v4790_v5 = vld [vmem:[#allocation5 + $0xc] ss:$24 sps:$4 sm:$0xff]   ;;  %v4788_v9 = vld [vmem:[#allocation5 + $0x8] ss:$24 sps:$4 sm:$0xff]   ;;  %v4797_v11 = vld [vmem:[#allocation5 + $0x3c] ss:$24 sps:$4 sm:$0xff]  }
  0x97   :  { %1952 = vmatprep.subr.bf16.mxu0 %v4724_v25  ;;  %v4794_v10 = vld [vmem:[#allocation5 + $0x634] ss:$24 sps:$4 sm:$0xff]   ;;  %v4792_v12 = vld [vmem:[#allocation5 + $0x630] ss:$24 sps:$4 sm:$0xff]   ;;  %v4800_v14 = vld [vmem:[#allocation5 + $0x664] ss:$24 sps:$4 sm:$0xff]  }
  0x98   :  { %v4795_v13 = vld [vmem:[#allocation5 + $0x38] ss:$24 sps:$4 sm:$0xff]   ;;  %v4803_v15 = vld [vmem:[#allocation5 + $0x6c] ss:$24 sps:$4 sm:$0xff]   ;;  %v4801_v17 = vld [vmem:[#allocation5 + $0x68] ss:$24 sps:$4 sm:$0xff]  }
  0x99   :  { %1912 = vmatpush1.bf16.msra.mxu1 %v4726_v26  ;;  %v4798_v16 = vld [vmem:[#allocation5 + $0x660] ss:$24 sps:$4 sm:$0xff]   ;;  %v4806_v18 = vld [vmem:[#allocation5 + $0x694] ss:$24 sps:$4 sm:$0xff]   ;;  %v4804_v20 = vld [vmem:[#allocation5 + $0x690] ss:$24 sps:$4 sm:$0xff]  }
  0x9a   :  { %1953 = vmatpush1.bf16.msra.mxu0 %v4727_v27  ;;  %1913 = vmatprep.subr.bf16.mxu1 %v4728_v28  ;;  %v4809_v19 = vld [vmem:[#allocation5 + $0x9c] ss:$24 sps:$4 sm:$0xff]   ;;  %v4807_v21 = vld [vmem:[#allocation5 + $0x98] ss:$24 sps:$4 sm:$0xff]   ;;  %v4815_v23 = vld [vmem:[#allocation5 + $0xcc] ss:$24 sps:$4 sm:$0xff]  }
  0x9b   :  { %1954 = vmatprep.subr.bf16.mxu0 %v4730_v29  ;;  %v4812_v22 = vld [vmem:[#allocation5 + $0x6c4] ss:$24 sps:$4 sm:$0xff]   ;;  %v4810_v24 = vld [vmem:[#allocation5 + $0x6c0] ss:$24 sps:$4 sm:$0xff]   ;;  %v4818_v26 = vld [vmem:[#allocation5 + $0x6f4] ss:$24 sps:$4 sm:$0xff]  }
  0x9c   :  { %v4813_v25 = vld [vmem:[#allocation5 + $0xc8] ss:$24 sps:$4 sm:$0xff]   ;;  %v4821_v27 = vld [vmem:[#allocation5 + $0xfc] ss:$24 sps:$4 sm:$0xff]   ;;  %v4819_v29 = vld [vmem:[#allocation5 + $0xf8] ss:$24 sps:$4 sm:$0xff]  }
  0x9d   :  { %1914 = vmatpush1.bf16.msra.mxu1 %v4732_v30  ;;  %v4816_v28 = vld [vmem:[#allocation5 + $0x6f0] ss:$24 sps:$4 sm:$0xff]   ;;  %v4824_v30 = vld [vmem:[#allocation5 + $0x724] ss:$24 sps:$4 sm:$0xff]   ;;  %s4049_s13 = sshll.u32 %s5645_s6, 4  ;;  %s4050_s13 = int_to_ptr.vmem [resolvable:$true] %s4049_s13 }
  0x9e   :  { %1955 = vmatpush1.bf16.msra.mxu0 %v4733_v31  ;;  %1915 = vmatprep.subr.bf16.mxu1 %v4734_v32  ;;  %v4827_v31 = vld [vmem:[#allocation5 + $0x12c] ss:$24 sps:$4 sm:$0xff]   ;;  %v5783_v32 = vld [vmem:[#allocation2 + $0x10] sm:$0xff]  ;;  %v4840_v46 = vld [vmem:[#allocation5 + $0x7b0] ss:$24 sps:$4 sm:$0xff]   ;;  %s5600_s14 = scalar_lea.vmem %s4050_s13, 128  ;;  %p5605_p1 = scmp.lt.s32.totalorder %s4050_s13, %s4050_s13 }
  0x9f   :  { %1956 = vmatprep.subr.bf16.mxu0 %v4736_v33  ;;  %v4822_v33 = vld [vmem:[#allocation5 + $0x720] ss:$24 sps:$4 sm:$0xff]   ;;  %p5601_p0 = scmp.ne.s32.totalorder %s4050_s13, %s5600_s14  ;;  %p5606_p2 = scmp.lt.s32.totalorder %s5600_s14, %s5600_s14 }
  0xa0   :  { %v4843_v48 = vld [vmem:[#allocation5 + $0x1b8] ss:$24 sps:$4 sm:$0xff]  }
  0xa1   :  { %1916 = vmatpush1.bf16.msra.mxu1 %v4738_v34  ;;  %v5787_v34 = vcombine.high %v5783_v32, %v5783_v32  ;;  %p5607_p3 = por %p5606_p2, %p5605_p1 }
  0xa2   :  { %1957 = vmatpush1.bf16.msra.mxu0 %v4739_v35  ;;  %1917 = vmatprep.subr.bf16.mxu1 %v4740_v36  ;;  %v4825_v35 = vld [vmem:[#allocation5 + $0x128] ss:$24 sps:$4 sm:$0xff]   ;;  %v4830_v36 = vld [vmem:[#allocation5 + $0x754] ss:$24 sps:$4 sm:$0xff]  }
  0xa3   :  { %1958 = vmatprep.subr.bf16.mxu0 %v4742_v37  ;;  %v4833_v37 = vld [vmem:[#allocation5 + $0x15c] ss:$24 sps:$4 sm:$0xff]   ;;  %p5608_p4 = pnand %p5607_p3, %p5601_p0 }
  0xa5   :  { %1918 = vmatpush1.bf16.msra.mxu1 %v4744_v38  ;;  %v4828_v38 = vld [vmem:[#allocation5 + $0x750] ss:$24 sps:$4 sm:$0xff]  }
  0xa6   :  { %1959 = vmatpush1.bf16.msra.mxu0 %v4745_v39  ;;  %1919 = vmatprep.subr.bf16.mxu1 %v4746_v40  ;;  %v4831_v39 = vld [vmem:[#allocation5 + $0x158] ss:$24 sps:$4 sm:$0xff]   ;;  %v4836_v40 = vld [vmem:[#allocation5 + $0x784] ss:$24 sps:$4 sm:$0xff]  }
  0xa7   :  { %1960 = vmatprep.subr.bf16.mxu0 %v4748_v41  ;;  %v4839_v41 = vld [vmem:[#allocation5 + $0x18c] ss:$24 sps:$4 sm:$0xff]  }
  0xa9   :  { %1920 = vmatpush1.bf16.msra.mxu1 %v4750_v42  ;;  %v4834_v42 = vld [vmem:[#allocation5 + $0x780] ss:$24 sps:$4 sm:$0xff]  }
  0xaa   :  { %1961 = vmatpush1.bf16.msra.mxu0 %v4751_v43  ;;  %1921 = vmatprep.subr.bf16.mxu1 %v4752_v44  ;;  %v4837_v43 = vld [vmem:[#allocation5 + $0x188] ss:$24 sps:$4 sm:$0xff]   ;;  %v4842_v44 = vld [vmem:[#allocation5 + $0x7b4] ss:$24 sps:$4 sm:$0xff]  }
  0xab   :  { %1962 = vmatprep.subr.bf16.mxu0 %v4754_v45  ;;  %v4845_v45 = vld [vmem:[#allocation5 + $0x1bc] ss:$24 sps:$4 sm:$0xff]  }
  0xad   :  { %1922 = vmatpush1.bf16.msra.mxu1 %v4756_v49  ;;  %v4848_v49 = vld [vmem:[#allocation5 + $0x7e4] ss:$24 sps:$4 sm:$0xff]  }
  0xae   :  { %1963 = vmatpush1.bf16.msra.mxu0 %v4757_v50  ;;  %1923 = vmatprep.subr.bf16.mxu1 %v4758_v52  ;;  %v4851_v50 = vld [vmem:[#allocation5 + $0x1ec] ss:$24 sps:$4 sm:$0xff]   ;;  %v4846_v52 = vld [vmem:[#allocation5 + $0x7e0] ss:$24 sps:$4 sm:$0xff]  }
  0xaf   :  { %1964 = vmatprep.subr.bf16.mxu0 %v4760_v53  ;;  %v4849_v53 = vld [vmem:[#allocation5 + $0x1e8] ss:$24 sps:$4 sm:$0xff]  }
  0xb1   :  { %1924 = vmatpush1.bf16.msra.mxu1 %v4762_v54  ;;  %v4854_v54 = vld [vmem:[#allocation5 + $0x814] ss:$24 sps:$4 sm:$0xff]  }
  0xb2   :  { %1965 = vmatpush1.bf16.msra.mxu0 %v4763_v55  ;;  %1925 = vmatprep.subr.bf16.mxu1 %v4764_v56  ;;  %v4857_v55 = vld [vmem:[#allocation5 + $0x21c] ss:$24 sps:$4 sm:$0xff]   ;;  %v4852_v56 = vld [vmem:[#allocation5 + $0x810] ss:$24 sps:$4 sm:$0xff]  }
  0xb3   :  { %1966 = vmatprep.subr.bf16.mxu0 %v4766_v57  ;;  %v4855_v57 = vld [vmem:[#allocation5 + $0x218] ss:$24 sps:$4 sm:$0xff]  }
  0xb5   :  { %1926 = vmatpush1.bf16.msra.mxu1 %v4768_v58  ;;  %v4860_v58 = vld [vmem:[#allocation5 + $0x844] ss:$24 sps:$4 sm:$0xff]  }
  0xb6   :  { %1967 = vmatpush1.bf16.msra.mxu0 %v4769_v59  ;;  %1927 = vmatprep.subr.bf16.mxu1 %v4770_v60  ;;  %v4863_v59 = vld [vmem:[#allocation5 + $0x24c] ss:$24 sps:$4 sm:$0xff]   ;;  %v4858_v60 = vld [vmem:[#allocation5 + $0x840] ss:$24 sps:$4 sm:$0xff]  }
  0xb7   :  { %1968 = vmatprep.subr.bf16.mxu0 %v4772_v61  ;;  %v4861_v61 = vld [vmem:[#allocation5 + $0x248] ss:$24 sps:$4 sm:$0xff]  }
  0xb9   :  { %1928 = vmatpush1.bf16.msra.mxu1 %v4774_v62  ;;  %v4866_v62 = vld [vmem:[#allocation5 + $0x874] ss:$24 sps:$4 sm:$0xff]  }
  0xba   :  { %1969 = vmatpush1.bf16.msra.mxu0 %v4775_v63  ;;  %1929 = vmatprep.subr.bf16.mxu1 %v4776_v0  ;;  %v4869_v63 = vld [vmem:[#allocation5 + $0x27c] ss:$24 sps:$4 sm:$0xff]   ;;  %v4864_v0 = vld [vmem:[#allocation5 + $0x870] ss:$24 sps:$4 sm:$0xff]  }
  0xbb   :  { %1970 = vmatprep.subr.bf16.mxu0 %v4778_v1  ;;  %v4867_v1 = vld [vmem:[#allocation5 + $0x278] ss:$24 sps:$4 sm:$0xff]  }
  0xbd   :  { %1930 = vmatpush1.bf16.msra.mxu1 %v4780_v2  ;;  %v4872_v2 = vld [vmem:[#allocation5 + $0x8a4] ss:$24 sps:$4 sm:$0xff]  }
  0xbe   :  { %1971 = vmatpush1.bf16.msra.mxu0 %v4781_v3  ;;  %2022 = vmatprep.subr.bf16.mxu1 %v4790_v5  ;;  %v4875_v3 = vld [vmem:[#allocation5 + $0x2ac] ss:$24 sps:$4 sm:$0xff]   ;;  %v4873_v5 = vld [vmem:[#allocation5 + $0x2a8] ss:$24 sps:$4 sm:$0xff]  }
  0xbf   :  { %1981 = vmatprep.subr.bf16.mxu0 %v4787_v4  ;;  %v4870_v4 = vld [vmem:[#allocation5 + $0x8a0] ss:$24 sps:$4 sm:$0xff]  }
  0xc0   :  { %1932 = vmatmul.mubr.bf16.vlgmr.msra.gmra.mrb[0].mxu1 %v5776_v6 }
  0xc1   :  { %1973 = vmatmul.mubr.bf16.vlgmr.msra.gmra.mrb[0].mxu0 %v5778_v7  ;;  %2023 = vmatpush1.bf16.msra.mxu1 %v4788_v9  ;;  %v4881_v9 = vld [vmem:[#allocation5 + $0x2dc] ss:$24 sps:$4 sm:$0xff]  }
  0xc2   :  { %1982 = vmatpush1.bf16.msra.mxu0 %v4785_v8  ;;  %2024 = vmatprep.subr.bf16.mxu1 %v4797_v11  ;;  %v4878_v8 = vld [vmem:[#allocation5 + $0x8d4] ss:$24 sps:$4 sm:$0xff]   ;;  %v4879_v11 = vld [vmem:[#allocation5 + $0x2d8] ss:$24 sps:$4 sm:$0xff]  }
  0xc3   :  { %1983 = vmatprep.subr.bf16.mxu0 %v4794_v10  ;;  %2054 = vmatprep.mubr.bf16.mxu1 %v5770_v47  ;;  %v4876_v10 = vld [vmem:[#allocation5 + $0x8d0] ss:$24 sps:$4 sm:$0xff]  }
  0xc4   :  { %2013 = vmatprep.mubr.bf16.mxu0 %v5787_v34 }
  0xc5   :  { %2025 = vmatpush1.bf16.msra.mxu1 %v4795_v13  ;;  %v4889_v13 = vld [vmem:[#allocation5 + $0x14] ss:$24 sps:$4 sm:$0xff]  }
  0xc6   :  { %1984 = vmatpush1.bf16.msra.mxu0 %v4792_v12  ;;  %2026 = vmatprep.subr.bf16.mxu1 %v4803_v15  ;;  %v4886_v12 = vld [vmem:[#allocation5 + $0x30c] ss:$24 sps:$4 sm:$0xff]   ;;  %v4884_v15 = vld [vmem:[#allocation5 + $0x308] ss:$24 sps:$4 sm:$0xff]  }
  0xc7   :  { %1985 = vmatprep.subr.bf16.mxu0 %v4800_v14  ;;  %v5792_v14 = vcombine.low %v5783_v32, %v5783_v32  ;;  %v4916_v32 = vld [vmem:[#allocation5 + $0x3fc] ss:$24 sps:$4 sm:$0xff]  }
  0xc9   :  { %2027 = vmatpush1.bf16.msra.mxu1 %v4801_v17  ;;  %v4892_v17 = vld [vmem:[#allocation5 + $0x33c] ss:$24 sps:$4 sm:$0xff]  }
  0xca   :  { %1986 = vmatpush1.bf16.msra.mxu0 %v4798_v16  ;;  %2028 = vmatprep.subr.bf16.mxu1 %v4809_v19  ;;  %v4887_v16 = vld [vmem:[#allocation5 + $0x10] ss:$24 sps:$4 sm:$0xff]  }
  0xcb   :  { %1987 = vmatprep.subr.bf16.mxu0 %v4806_v18  ;;  %v4895_v18 = vld [vmem:[#allocation5 + $0x44] ss:$24 sps:$4 sm:$0xff]   ;;  %v4890_v19 = vld [vmem:[#allocation5 + $0x338] ss:$24 sps:$4 sm:$0xff]  }
  0xcd   :  { %2029 = vmatpush1.bf16.msra.mxu1 %v4807_v21  ;;  %v4898_v21 = vld [vmem:[#allocation5 + $0x36c] ss:$24 sps:$4 sm:$0xff]  }
  0xce   :  { %1988 = vmatpush1.bf16.msra.mxu0 %v4804_v20  ;;  %2030 = vmatprep.subr.bf16.mxu1 %v4815_v23  ;;  %v4893_v20 = vld [vmem:[#allocation5 + $0x40] ss:$24 sps:$4 sm:$0xff]  }
  0xcf   :  { %1989 = vmatprep.subr.bf16.mxu0 %v4812_v22  ;;  %v4901_v22 = vld [vmem:[#allocation5 + $0x74] ss:$24 sps:$4 sm:$0xff]   ;;  %v4896_v23 = vld [vmem:[#allocation5 + $0x368] ss:$24 sps:$4 sm:$0xff]  }
  0xd1   :  { %2031 = vmatpush1.bf16.msra.mxu1 %v4813_v25  ;;  %v4904_v25 = vld [vmem:[#allocation5 + $0x39c] ss:$24 sps:$4 sm:$0xff]  }
  0xd2   :  { %1990 = vmatpush1.bf16.msra.mxu0 %v4810_v24  ;;  %2032 = vmatprep.subr.bf16.mxu1 %v4821_v27  ;;  %v4899_v24 = vld [vmem:[#allocation5 + $0x70] ss:$24 sps:$4 sm:$0xff]  }
  0xd3   :  { %1991 = vmatprep.subr.bf16.mxu0 %v4818_v26  ;;  %v4907_v26 = vld [vmem:[#allocation5 + $0xa4] ss:$24 sps:$4 sm:$0xff]   ;;  %v4902_v27 = vld [vmem:[#allocation5 + $0x398] ss:$24 sps:$4 sm:$0xff]  }
  0xd5   :  { %2033 = vmatpush1.bf16.msra.mxu1 %v4819_v29  ;;  %v4910_v29 = vld [vmem:[#allocation5 + $0x3cc] ss:$24 sps:$4 sm:$0xff]  }
  0xd6   :  { %1992 = vmatpush1.bf16.msra.mxu0 %v4816_v28  ;;  %2034 = vmatprep.subr.bf16.mxu1 %v4827_v31  ;;  %v4905_v28 = vld [vmem:[#allocation5 + $0xa0] ss:$24 sps:$4 sm:$0xff]  }
  0xd7   :  { %1993 = vmatprep.subr.bf16.mxu0 %v4824_v30  ;;  %v4913_v30 = vld [vmem:[#allocation5 + $0xd4] ss:$24 sps:$4 sm:$0xff]   ;;  %v4908_v31 = vld [vmem:[#allocation5 + $0x3c8] ss:$24 sps:$4 sm:$0xff]  }
  0xd9   :  { %2035 = vmatpush1.bf16.msra.mxu1 %v4825_v35  ;;  %v4914_v35 = vld [vmem:[#allocation5 + $0x3f8] ss:$24 sps:$4 sm:$0xff]  }
  0xda   :  { %1994 = vmatpush1.bf16.msra.mxu0 %v4822_v33  ;;  %2036 = vmatprep.subr.bf16.mxu1 %v4833_v37  ;;  %v4919_v33 = vld [vmem:[#allocation5 + $0x104] ss:$24 sps:$4 sm:$0xff]  }
  0xdb   :  { %1995 = vmatprep.subr.bf16.mxu0 %v4830_v36  ;;  %v4917_v36 = vld [vmem:[#allocation5 + $0x100] ss:$24 sps:$4 sm:$0xff]   ;;  %v4922_v37 = vld [vmem:[#allocation5 + $0x42c] ss:$24 sps:$4 sm:$0xff]  }
  0xdd   :  { %2037 = vmatpush1.bf16.msra.mxu1 %v4831_v39  ;;  %v4920_v39 = vld [vmem:[#allocation5 + $0x428] ss:$24 sps:$4 sm:$0xff]  }
  0xde   :  { %1996 = vmatpush1.bf16.msra.mxu0 %v4828_v38  ;;  %2038 = vmatprep.subr.bf16.mxu1 %v4839_v41  ;;  %v4925_v38 = vld [vmem:[#allocation5 + $0x134] ss:$24 sps:$4 sm:$0xff]  }
  0xdf   :  { %1997 = vmatprep.subr.bf16.mxu0 %v4836_v40  ;;  %v4923_v40 = vld [vmem:[#allocation5 + $0x130] ss:$24 sps:$4 sm:$0xff]   ;;  %v4928_v41 = vld [vmem:[#allocation5 + $0x45c] ss:$24 sps:$4 sm:$0xff]  }
  0xe1   :  { %2039 = vmatpush1.bf16.msra.mxu1 %v4837_v43  ;;  %v4926_v43 = vld [vmem:[#allocation5 + $0x458] ss:$24 sps:$4 sm:$0xff]  }
  0xe2   :  { %1998 = vmatpush1.bf16.msra.mxu0 %v4834_v42  ;;  %2040 = vmatprep.subr.bf16.mxu1 %v4845_v45  ;;  %v4931_v42 = vld [vmem:[#allocation5 + $0x164] ss:$24 sps:$4 sm:$0xff]  }
  0xe3   :  { %1999 = vmatprep.subr.bf16.mxu0 %v4842_v44  ;;  %v4929_v44 = vld [vmem:[#allocation5 + $0x160] ss:$24 sps:$4 sm:$0xff]   ;;  %v4934_v45 = vld [vmem:[#allocation5 + $0x48c] ss:$24 sps:$4 sm:$0xff]  }
  0xe5   :  { %2041 = vmatpush1.bf16.msra.mxu1 %v4843_v48  ;;  %v4932_v48 = vld [vmem:[#allocation5 + $0x488] ss:$24 sps:$4 sm:$0xff]  }
  0xe6   :  { %2000 = vmatpush1.bf16.msra.mxu0 %v4840_v46  ;;  %2042 = vmatprep.subr.bf16.mxu1 %v4851_v50  ;;  %v4937_v46 = vld [vmem:[#allocation5 + $0x194] ss:$24 sps:$4 sm:$0xff]  }
  0xe7   :  { %2001 = vmatprep.subr.bf16.mxu0 %v4848_v49  ;;  %v4935_v49 = vld [vmem:[#allocation5 + $0x190] ss:$24 sps:$4 sm:$0xff]   ;;  %v4940_v50 = vld [vmem:[#allocation5 + $0x4bc] ss:$24 sps:$4 sm:$0xff]  }
  0xe9   :  { %2043 = vmatpush1.bf16.msra.mxu1 %v4849_v53  ;;  %v4938_v53 = vld [vmem:[#allocation5 + $0x4b8] ss:$24 sps:$4 sm:$0xff]  }
  0xea   :  { %2002 = vmatpush1.bf16.msra.mxu0 %v4846_v52  ;;  %2044 = vmatprep.subr.bf16.mxu1 %v4857_v55  ;;  %v4943_v52 = vld [vmem:[#allocation5 + $0x1c4] ss:$24 sps:$4 sm:$0xff]  }
  0xeb   :  { %2003 = vmatprep.subr.bf16.mxu0 %v4854_v54  ;;  %v4941_v54 = vld [vmem:[#allocation5 + $0x1c0] ss:$24 sps:$4 sm:$0xff]   ;;  %v4946_v55 = vld [vmem:[#allocation5 + $0x4ec] ss:$24 sps:$4 sm:$0xff]  }
  0xed   :  { %2045 = vmatpush1.bf16.msra.mxu1 %v4855_v57  ;;  %v4944_v57 = vld [vmem:[#allocation5 + $0x4e8] ss:$24 sps:$4 sm:$0xff]  }
  0xee   :  { %2004 = vmatpush1.bf16.msra.mxu0 %v4852_v56  ;;  %2046 = vmatprep.subr.bf16.mxu1 %v4863_v59  ;;  %v4949_v56 = vld [vmem:[#allocation5 + $0x1f4] ss:$24 sps:$4 sm:$0xff]  }
  0xef   :  { %2005 = vmatprep.subr.bf16.mxu0 %v4860_v58  ;;  %v4947_v58 = vld [vmem:[#allocation5 + $0x1f0] ss:$24 sps:$4 sm:$0xff]   ;;  %v4952_v59 = vld [vmem:[#allocation5 + $0x51c] ss:$24 sps:$4 sm:$0xff]  }
  0xf1   :  { %2047 = vmatpush1.bf16.msra.mxu1 %v4861_v61  ;;  %v4950_v61 = vld [vmem:[#allocation5 + $0x518] ss:$24 sps:$4 sm:$0xff]  }
  0xf2   :  { %2006 = vmatpush1.bf16.msra.mxu0 %v4858_v60  ;;  %2048 = vmatprep.subr.bf16.mxu1 %v4869_v63  ;;  %v4955_v60 = vld [vmem:[#allocation5 + $0x224] ss:$24 sps:$4 sm:$0xff]  }
  0xf3   :  { %2007 = vmatprep.subr.bf16.mxu0 %v4866_v62  ;;  %v4953_v62 = vld [vmem:[#allocation5 + $0x220] ss:$24 sps:$4 sm:$0xff]   ;;  %v4958_v63 = vld [vmem:[#allocation5 + $0x54c] ss:$24 sps:$4 sm:$0xff]  }
  0xf5   :  { %2049 = vmatpush1.bf16.msra.mxu1 %v4867_v1  ;;  %v4956_v1 = vld [vmem:[#allocation5 + $0x548] ss:$24 sps:$4 sm:$0xff]  }
  0xf6   :  { %2008 = vmatpush1.bf16.msra.mxu0 %v4864_v0  ;;  %2050 = vmatprep.subr.bf16.mxu1 %v4875_v3  ;;  %v4961_v0 = vld [vmem:[#allocation5 + $0x254] ss:$24 sps:$4 sm:$0xff]  }
  0xf7   :  { %2009 = vmatprep.subr.bf16.mxu0 %v4872_v2  ;;  %v4959_v2 = vld [vmem:[#allocation5 + $0x250] ss:$24 sps:$4 sm:$0xff]   ;;  %v4964_v3 = vld [vmem:[#allocation5 + $0x57c] ss:$24 sps:$4 sm:$0xff]  }
  0xf9   :  { %2051 = vmatpush1.bf16.msra.mxu1 %v4873_v5  ;;  %v4962_v5 = vld [vmem:[#allocation5 + $0x578] ss:$24 sps:$4 sm:$0xff]  }
  0xfa   :  { %2010 = vmatpush1.bf16.msra.mxu0 %v4870_v4  ;;  %2052 = vmatprep.subr.bf16.mxu1 %v4881_v9  ;;  %v4967_v4 = vld [vmem:[#allocation5 + $0x284] ss:$24 sps:$4 sm:$0xff]  }
  0xfb   :  { %2011 = vmatprep.subr.bf16.mxu0 %v4878_v8  ;;  %v4965_v8 = vld [vmem:[#allocation5 + $0x280] ss:$24 sps:$4 sm:$0xff]   ;;  %v4970_v9 = vld [vmem:[#allocation5 + $0x5ac] ss:$24 sps:$4 sm:$0xff]  }
  0xfd   :  { %2053 = vmatpush1.bf16.msra.mxu1 %v4879_v11  ;;  %v4968_v11 = vld [vmem:[#allocation5 + $0x5a8] ss:$24 sps:$4 sm:$0xff]  }
  0xfe   :  { %2012 = vmatpush1.bf16.msra.mxu0 %v4876_v10  ;;  %2063 = vmatprep.subr.bf16.mxu1 %v4886_v12  ;;  %v4973_v10 = vld [vmem:[#allocation5 + $0x2b4] ss:$24 sps:$4 sm:$0xff]   ;;  %v4971_v12 = vld [vmem:[#allocation5 + $0x2b0] ss:$24 sps:$4 sm:$0xff]  }
  0xff   :  { %2145 = vmatprep.subr.bf16.mxu0 %v4889_v13  ;;  %v4976_v13 = vld [vmem:[#allocation5 + $0x5dc] ss:$24 sps:$4 sm:$0xff]  }
 0x100   :  { %2055 = vmatmul.mubr.bf16.vlgmr.msra.gmra.mrb[4].mxu1 %v5776_v6 }
 0x101   :  { %2014 = vmatmul.mubr.bf16.vlgmr.msra.gmra.mrb[0].mxu0 %v5792_v14  ;;  %2064 = vmatpush1.bf16.msra.mxu1 %v4884_v15  ;;  %v4979_v15 = vld [vmem:[#allocation5 + $0x2e4] ss:$24 sps:$4 sm:$0xff]  }
 0x102   :  { %2146 = vmatpush1.bf16.msra.mxu0 %v4887_v16  ;;  %2065 = vmatprep.subr.bf16.mxu1 %v4892_v17  ;;  %v4974_v16 = vld [vmem:[#allocation5 + $0x5d8] ss:$24 sps:$4 sm:$0xff]  }
 0x103   :  { %2147 = vmatprep.subr.bf16.mxu0 %v4895_v18  ;;  %2095 = vmatprep.mubr.bf16.mxu1 %v5772_v51  ;;  %v4977_v17 = vld [vmem:[#allocation5 + $0x2e0] ss:$24 sps:$4 sm:$0xff]   ;;  %v4982_v18 = vld [vmem:[#allocation5 + $0x60c] ss:$24 sps:$4 sm:$0xff]  }
 0x104   :  { %2177 = vmatprep.mubr.bf16.mxu0 %v5770_v47  ;;  %v4911_v47 = vld [vmem:[#allocation5 + $0xd0] ss:$24 sps:$4 sm:$0xff]  }
 0x105   :  { %2066 = vmatpush1.bf16.msra.mxu1 %v4890_v19  ;;  %v4985_v19 = vld [vmem:[#allocation5 + $0x314] ss:$24 sps:$4 sm:$0xff]  }
 0x106   :  { %2148 = vmatpush1.bf16.msra.mxu0 %v4893_v20  ;;  %2067 = vmatprep.subr.bf16.mxu1 %v4898_v21  ;;  %v4980_v20 = vld [vmem:[#allocation5 + $0x608] ss:$24 sps:$4 sm:$0xff]  }
 0x107   :  { %2149 = vmatprep.subr.bf16.mxu0 %v4901_v22  ;;  %v4983_v21 = vld [vmem:[#allocation5 + $0x310] ss:$24 sps:$4 sm:$0xff]   ;;  %v4988_v22 = vld [vmem:[#allocation5 + $0x63c] ss:$24 sps:$4 sm:$0xff]  }
 0x109   :  { %2068 = vmatpush1.bf16.msra.mxu1 %v4896_v23  ;;  %v4991_v23 = vld [vmem:[#allocation5 + $0x344] ss:$24 sps:$4 sm:$0xff]  }
 0x10a   :  { %2150 = vmatpush1.bf16.msra.mxu0 %v4899_v24  ;;  %2069 = vmatprep.subr.bf16.mxu1 %v4904_v25  ;;  %v4986_v24 = vld [vmem:[#allocation5 + $0x638] ss:$24 sps:$4 sm:$0xff]  }
 0x10b   :  { %2151 = vmatprep.subr.bf16.mxu0 %v4907_v26  ;;  %v4989_v25 = vld [vmem:[#allocation5 + $0x340] ss:$24 sps:$4 sm:$0xff]   ;;  %v4994_v26 = vld [vmem:[#allocation5 + $0x66c] ss:$24 sps:$4 sm:$0xff]  }
 0x10d   :  { %2070 = vmatpush1.bf16.msra.mxu1 %v4902_v27  ;;  %v4997_v27 = vld [vmem:[#allocation5 + $0x374] ss:$24 sps:$4 sm:$0xff]  }
 0x10e   :  { %2152 = vmatpush1.bf16.msra.mxu0 %v4905_v28  ;;  %2071 = vmatprep.subr.bf16.mxu1 %v4910_v29  ;;  %v4992_v28 = vld [vmem:[#allocation5 + $0x668] ss:$24 sps:$4 sm:$0xff]  }
 0x10f   :  { %2153 = vmatprep.subr.bf16.mxu0 %v4913_v30  ;;  %v4995_v29 = vld [vmem:[#allocation5 + $0x370] ss:$24 sps:$4 sm:$0xff]   ;;  %v5000_v30 = vld [vmem:[#allocation5 + $0x69c] ss:$24 sps:$4 sm:$0xff]  }
 0x111   :  { %2072 = vmatpush1.bf16.msra.mxu1 %v4908_v31  ;;  %v4998_v31 = vld [vmem:[#allocation5 + $0x698] ss:$24 sps:$4 sm:$0xff]  }
 0x112   :  { %2154 = vmatpush1.bf16.msra.mxu0 %v4911_v47  ;;  %2073 = vmatprep.subr.bf16.mxu1 %v4916_v32  ;;  %v5001_v47 = vld [vmem:[#allocation5 + $0x3a0] ss:$24 sps:$4 sm:$0xff]   ;;  %v5006_v32 = vld [vmem:[#allocation5 + $0x6cc] ss:$24 sps:$4 sm:$0xff]  }
 0x113   :  { %2155 = vmatprep.subr.bf16.mxu0 %v4919_v33  ;;  %v5009_v33 = vld [vmem:[#allocation5 + $0x3d4] ss:$24 sps:$4 sm:$0xff]  }
 0x115   :  { %2074 = vmatpush1.bf16.msra.mxu1 %v4914_v35  ;;  %v5004_v35 = vld [vmem:[#allocation5 + $0x6c8] ss:$24 sps:$4 sm:$0xff]  }
 0x116   :  { %2156 = vmatpush1.bf16.msra.mxu0 %v4917_v36  ;;  %2075 = vmatprep.subr.bf16.mxu1 %v4922_v37  ;;  %v5007_v36 = vld [vmem:[#allocation5 + $0x3d0] ss:$24 sps:$4 sm:$0xff]   ;;  %v5015_v37 = vld [vmem:[#allocation5 + $0x404] ss:$24 sps:$4 sm:$0xff]  }
 0x117   :  { %2157 = vmatprep.subr.bf16.mxu0 %v4925_v38  ;;  %v5010_v38 = vld [vmem:[#allocation5 + $0x6f8] ss:$24 sps:$4 sm:$0xff]  }
 0x119   :  { %2076 = vmatpush1.bf16.msra.mxu1 %v4920_v39  ;;  %v5013_v39 = vld [vmem:[#allocation5 + $0x400] ss:$24 sps:$4 sm:$0xff]  }
 0x11a   :  { %2158 = vmatpush1.bf16.msra.mxu0 %v4923_v40  ;;  %2077 = vmatprep.subr.bf16.mxu1 %v4928_v41  ;;  %v5018_v40 = vld [vmem:[#allocation5 + $0x72c] ss:$24 sps:$4 sm:$0xff]  }
 0x11b   :  { %2159 = vmatprep.subr.bf16.mxu0 %v4931_v42  ;;  %v5021_v41 = vld [vmem:[#allocation5 + $0x434] ss:$24 sps:$4 sm:$0xff]   ;;  %v5016_v42 = vld [vmem:[#allocation5 + $0x728] ss:$24 sps:$4 sm:$0xff]  }
 0x11d   :  { %2078 = vmatpush1.bf16.msra.mxu1 %v4926_v43  ;;  %v5019_v43 = vld [vmem:[#allocation5 + $0x430] ss:$24 sps:$4 sm:$0xff]  }
 0x11e   :  { %2160 = vmatpush1.bf16.msra.mxu0 %v4929_v44  ;;  %2079 = vmatprep.subr.bf16.mxu1 %v4934_v45  ;;  %v5024_v44 = vld [vmem:[#allocation5 + $0x75c] ss:$24 sps:$4 sm:$0xff]  }
 0x11f   :  { %2161 = vmatprep.subr.bf16.mxu0 %v4937_v46  ;;  %v5027_v45 = vld [vmem:[#allocation5 + $0x464] ss:$24 sps:$4 sm:$0xff]   ;;  %v5022_v46 = vld [vmem:[#allocation5 + $0x758] ss:$24 sps:$4 sm:$0xff]  }
 0x121   :  { %2080 = vmatpush1.bf16.msra.mxu1 %v4932_v48  ;;  %v5025_v48 = vld [vmem:[#allocation5 + $0x460] ss:$24 sps:$4 sm:$0xff]  }
 0x122   :  { %2162 = vmatpush1.bf16.msra.mxu0 %v4935_v49  ;;  %2081 = vmatprep.subr.bf16.mxu1 %v4940_v50  ;;  %v5030_v49 = vld [vmem:[#allocation5 + $0x78c] ss:$24 sps:$4 sm:$0xff]  }
 0x123   :  { %2163 = vmatprep.subr.bf16.mxu0 %v4943_v52  ;;  %v5033_v50 = vld [vmem:[#allocation5 + $0x494] ss:$24 sps:$4 sm:$0xff]   ;;  %v5028_v52 = vld [vmem:[#allocation5 + $0x788] ss:$24 sps:$4 sm:$0xff]  }
 0x125   :  { %2082 = vmatpush1.bf16.msra.mxu1 %v4938_v53  ;;  %v5031_v53 = vld [vmem:[#allocation5 + $0x490] ss:$24 sps:$4 sm:$0xff]  }
 0x126   :  { %2164 = vmatpush1.bf16.msra.mxu0 %v4941_v54  ;;  %2083 = vmatprep.subr.bf16.mxu1 %v4946_v55  ;;  %v5036_v54 = vld [vmem:[#allocation5 + $0x7bc] ss:$24 sps:$4 sm:$0xff]  }
 0x127   :  { %2165 = vmatprep.subr.bf16.mxu0 %v4949_v56  ;;  %v5039_v55 = vld [vmem:[#allocation5 + $0x4c4] ss:$24 sps:$4 sm:$0xff]   ;;  %v5034_v56 = vld [vmem:[#allocation5 + $0x7b8] ss:$24 sps:$4 sm:$0xff]  }
 0x129   :  { %2084 = vmatpush1.bf16.msra.mxu1 %v4944_v57  ;;  %v5037_v57 = vld [vmem:[#allocation5 + $0x4c0] ss:$24 sps:$4 sm:$0xff]  }
 0x12a   :  { %2166 = vmatpush1.bf16.msra.mxu0 %v4947_v58  ;;  %2085 = vmatprep.subr.bf16.mxu1 %v4952_v59  ;;  %v5042_v58 = vld [vmem:[#allocation5 + $0x7ec] ss:$24 sps:$4 sm:$0xff]  }
 0x12b   :  { %2167 = vmatprep.subr.bf16.mxu0 %v4955_v60  ;;  %v5045_v59 = vld [vmem:[#allocation5 + $0x4f4] ss:$24 sps:$4 sm:$0xff]   ;;  %v5040_v60 = vld [vmem:[#allocation5 + $0x7e8] ss:$24 sps:$4 sm:$0xff]  }
 0x12d   :  { %2086 = vmatpush1.bf16.msra.mxu1 %v4950_v61  ;;  %v5043_v61 = vld [vmem:[#allocation5 + $0x4f0] ss:$24 sps:$4 sm:$0xff]  }
 0x12e   :  { %2168 = vmatpush1.bf16.msra.mxu0 %v4953_v62  ;;  %2087 = vmatprep.subr.bf16.mxu1 %v4958_v63  ;;  %v5048_v62 = vld [vmem:[#allocation5 + $0x81c] ss:$24 sps:$4 sm:$0xff]  }
 0x12f   :  { %2169 = vmatprep.subr.bf16.mxu0 %v4961_v0  ;;  %v5051_v63 = vld [vmem:[#allocation5 + $0x524] ss:$24 sps:$4 sm:$0xff]   ;;  %v5046_v0 = vld [vmem:[#allocation5 + $0x818] ss:$24 sps:$4 sm:$0xff]  }
 0x131   :  { %2088 = vmatpush1.bf16.msra.mxu1 %v4956_v1  ;;  %v5049_v1 = vld [vmem:[#allocation5 + $0x520] ss:$24 sps:$4 sm:$0xff]  }
 0x132   :  { %2170 = vmatpush1.bf16.msra.mxu0 %v4959_v2  ;;  %2089 = vmatprep.subr.bf16.mxu1 %v4964_v3  ;;  %v5054_v2 = vld [vmem:[#allocation5 + $0x84c] ss:$24 sps:$4 sm:$0xff]  }
 0x133   :  { %2171 = vmatprep.subr.bf16.mxu0 %v4967_v4  ;;  %v5057_v3 = vld [vmem:[#allocation5 + $0x554] ss:$24 sps:$4 sm:$0xff]   ;;  %v5052_v4 = vld [vmem:[#allocation5 + $0x848] ss:$24 sps:$4 sm:$0xff]  }
 0x135   :  { %2090 = vmatpush1.bf16.msra.mxu1 %v4962_v5  ;;  %v5055_v5 = vld [vmem:[#allocation5 + $0x550] ss:$24 sps:$4 sm:$0xff]  }
 0x136   :  { %2172 = vmatpush1.bf16.msra.mxu0 %v4965_v8  ;;  %2091 = vmatprep.subr.bf16.mxu1 %v4970_v9  ;;  %v5060_v8 = vld [vmem:[#allocation5 + $0x87c] ss:$24 sps:$4 sm:$0xff]  }
 0x137   :  { %2173 = vmatprep.subr.bf16.mxu0 %v4973_v10  ;;  %v5063_v9 = vld [vmem:[#allocation5 + $0x584] ss:$24 sps:$4 sm:$0xff]   ;;  %v5058_v10 = vld [vmem:[#allocation5 + $0x878] ss:$24 sps:$4 sm:$0xff]  }
 0x139   :  { %2092 = vmatpush1.bf16.msra.mxu1 %v4968_v11  ;;  %v5061_v11 = vld [vmem:[#allocation5 + $0x580] ss:$24 sps:$4 sm:$0xff]  }
 0x13a   :  { %2174 = vmatpush1.bf16.msra.mxu0 %v4971_v12  ;;  %2093 = vmatprep.subr.bf16.mxu1 %v4976_v13  ;;  %v5066_v12 = vld [vmem:[#allocation5 + $0x8ac] ss:$24 sps:$4 sm:$0xff]  }
 0x13b   :  { %2175 = vmatprep.subr.bf16.mxu0 %v4979_v15  ;;  %v5069_v13 = vld [vmem:[#allocation5 + $0x5b4] ss:$24 sps:$4 sm:$0xff]   ;;  %v5064_v15 = vld [vmem:[#allocation5 + $0x8a8] ss:$24 sps:$4 sm:$0xff]  }
 0x13d   :  { %2094 = vmatpush1.bf16.msra.mxu1 %v4974_v16  ;;  %v5067_v16 = vld [vmem:[#allocation5 + $0x5b0] ss:$24 sps:$4 sm:$0xff]  }
 0x13e   :  { %2176 = vmatpush1.bf16.msra.mxu0 %v4977_v17  ;;  %2104 = vmatprep.subr.bf16.mxu1 %v4982_v18  ;;  %v5072_v17 = vld [vmem:[#allocation5 + $0x8dc] ss:$24 sps:$4 sm:$0xff]  }
 0x13f   :  { %2186 = vmatprep.subr.bf16.mxu0 %v4985_v19  ;;  %v5075_v18 = vld [vmem:[#allocation5 + $0x5e4] ss:$24 sps:$4 sm:$0xff]   ;;  %v5070_v19 = vld [vmem:[#allocation5 + $0x8d8] ss:$24 sps:$4 sm:$0xff]  }
 0x140   :  { %2096 = vmatmul.mubr.bf16.vlgmr.msra.gmra.mrb[4].mxu1 %v5778_v7 }
 0x141   :  { %2178 = vmatmul.mubr.bf16.vlgmr.msra.gmra.mrb[4].mxu0 %v5776_v6  ;;  %2105 = vmatpush1.bf16.msra.mxu1 %v4980_v20  ;;  %v5003_v6 = vld [vmem:[#allocation5 + $0x3a4] ss:$24 sps:$4 sm:$0xff]   ;;  %v5073_v20 = vld [vmem:[#allocation5 + $0x5e0] ss:$24 sps:$4 sm:$0xff]  }
 0x142   :  { %2187 = vmatpush1.bf16.msra.mxu0 %v4983_v21  ;;  %2106 = vmatprep.subr.bf16.mxu1 %v4988_v22  ;;  %v5078_v21 = vld [vmem:[#allocation5 + $0x614] ss:$24 sps:$4 sm:$0xff]  }
 0x143   :  { %2188 = vmatprep.subr.bf16.mxu0 %v4991_v23  ;;  %2136 = vmatprep.mubr.bf16.mxu1 %v5787_v34  ;;  %v5099_v22 = vld [vmem:[#allocation8 + $0x4] ss:$16 sps:$4 sm:$0xff]  }
 0x144   :  { %2218 = vmatprep.mubr.bf16.mxu0 %v5772_v51  ;;  %v5012_v51 = vld [vmem:[#allocation5 + $0x6fc] ss:$24 sps:$4 sm:$0xff]   ;;  %v5076_v23 = vld [vmem:[#allocation5 + $0x610] ss:$24 sps:$4 sm:$0xff]  }
 0x145   :  { %2107 = vmatpush1.bf16.msra.mxu1 %v4986_v24  ;;  %v5097_v24 = vld [vmem:[#allocation8] ss:$16 sps:$4 sm:$0xff]  }
 0x146   :  { %2189 = vmatpush1.bf16.msra.mxu0 %v4989_v25  ;;  %2108 = vmatprep.subr.bf16.mxu1 %v4994_v26  ;;  %v5081_v25 = vld [vmem:[#allocation5 + $0x644] ss:$24 sps:$4 sm:$0xff]  }
 0x147   :  { %2190 = vmatprep.subr.bf16.mxu0 %v4997_v27  ;;  %v5105_v26 = vld [vmem:[#allocation8 + $0x24] ss:$16 sps:$4 sm:$0xff]  }
 0x148   :  { %v5079_v27 = vld [vmem:[#allocation5 + $0x640] ss:$24 sps:$4 sm:$0xff]  }
 0x149   :  { %2109 = vmatpush1.bf16.msra.mxu1 %v4992_v28  ;;  %v5103_v28 = vld [vmem:[#allocation8 + $0x20] ss:$16 sps:$4 sm:$0xff]  }
 0x14a   :  { %2191 = vmatpush1.bf16.msra.mxu0 %v4995_v29  ;;  %2110 = vmatprep.subr.bf16.mxu1 %v5000_v30  ;;  %v5084_v29 = vld [vmem:[#allocation5 + $0x674] ss:$24 sps:$4 sm:$0xff]  }
 0x14b   :  { %2192 = vmatprep.subr.bf16.mxu0 %v5003_v6  ;;  %v5111_v30 = vld [vmem:[#allocation8 + $0x44] ss:$16 sps:$4 sm:$0xff]  }
 0x14c   :  { %v5082_v6 = vld [vmem:[#allocation5 + $0x670] ss:$24 sps:$4 sm:$0xff]  }
 0x14d   :  { %2111 = vmatpush1.bf16.msra.mxu1 %v4998_v31  ;;  %v5087_v31 = vld [vmem:[#allocation5 + $0x6a4] ss:$24 sps:$4 sm:$0xff]  }
 0x14e   :  { %2193 = vmatpush1.bf16.msra.mxu0 %v5001_v47  ;;  %2112 = vmatprep.subr.bf16.mxu1 %v5006_v32  ;;  %v5109_v47 = vld [vmem:[#allocation8 + $0x40] ss:$16 sps:$4 sm:$0xff]   ;;  %v5117_v32 = vld [vmem:[#allocation8 + $0x64] ss:$16 sps:$4 sm:$0xff]  }
 0x14f   :  { %2194 = vmatprep.subr.bf16.mxu0 %v5009_v33  ;;  %v5090_v33 = vld [vmem:[#allocation5 + $0x6d4] ss:$24 sps:$4 sm:$0xff]  }
 0x151   :  { %2113 = vmatpush1.bf16.msra.mxu1 %v5004_v35  ;;  %v5115_v35 = vld [vmem:[#allocation8 + $0x60] ss:$16 sps:$4 sm:$0xff]  }
 0x152   :  { %2195 = vmatpush1.bf16.msra.mxu0 %v5007_v36  ;;  %2114 = vmatprep.subr.bf16.mxu1 %v5012_v51  ;;  %v5123_v36 = vld [vmem:[#allocation8 + $0x84] ss:$16 sps:$4 sm:$0xff]  }
 0x153   :  { %2196 = vmatprep.subr.bf16.mxu0 %v5015_v37  ;;  %v5088_v51 = vld [vmem:[#allocation5 + $0x6d0] ss:$24 sps:$4 sm:$0xff]   ;;  %v5093_v37 = vld [vmem:[#allocation5 + $0x704] ss:$24 sps:$4 sm:$0xff]  }
 0x155   :  { %2115 = vmatpush1.bf16.msra.mxu1 %v5010_v38  ;;  %v5129_v38 = vld [vmem:[#allocation8 + $0xa4] ss:$16 sps:$4 sm:$0xff]  }
 0x156   :  { %2197 = vmatpush1.bf16.msra.mxu0 %v5013_v39  ;;  %2116 = vmatprep.subr.bf16.mxu1 %v5018_v40  ;;  %v5091_v39 = vld [vmem:[#allocation5 + $0x700] ss:$24 sps:$4 sm:$0xff]   ;;  %v5096_v40 = vld [vmem:[#allocation5 + $0x734] ss:$24 sps:$4 sm:$0xff]  }
 0x157   :  { %2198 = vmatprep.subr.bf16.mxu0 %v5021_v41  ;;  %v5127_v41 = vld [vmem:[#allocation8 + $0xa0] ss:$16 sps:$4 sm:$0xff]  }
 0x159   :  { %2117 = vmatpush1.bf16.msra.mxu1 %v5016_v42  ;;  %v5135_v42 = vld [vmem:[#allocation8 + $0xc4] ss:$16 sps:$4 sm:$0xff]  }
 0x15a   :  { %2199 = vmatpush1.bf16.msra.mxu0 %v5019_v43  ;;  %2118 = vmatprep.subr.bf16.mxu1 %v5024_v44 }
 0x15b   :  { %2200 = vmatprep.subr.bf16.mxu0 %v5027_v45 }
 0x15d   :  { %2119 = vmatpush1.bf16.msra.mxu1 %v5022_v46  ;;  %v5094_v46 = vld [vmem:[#allocation5 + $0x730] ss:$24 sps:$4 sm:$0xff]  }
 0x15e   :  { %2201 = vmatpush1.bf16.msra.mxu0 %v5025_v48  ;;  %2120 = vmatprep.subr.bf16.mxu1 %v5030_v49  ;;  %v5133_v48 = vld [vmem:[#allocation8 + $0xc0] ss:$16 sps:$4 sm:$0xff]  }
 0x15f   :  { %2202 = vmatprep.subr.bf16.mxu0 %v5033_v50  ;;  %v5102_v50 = vld [vmem:[#allocation5 + $0x764] ss:$24 sps:$4 sm:$0xff]  }
 0x161   :  { %2121 = vmatpush1.bf16.msra.mxu1 %v5028_v52  ;;  %v5141_v52 = vld [vmem:[#allocation8 + $0xe4] ss:$16 sps:$4 sm:$0xff]  }
 0x162   :  { %2203 = vmatpush1.bf16.msra.mxu0 %v5031_v53  ;;  %2122 = vmatprep.subr.bf16.mxu1 %v5036_v54  ;;  %v5100_v53 = vld [vmem:[#allocation5 + $0x760] ss:$24 sps:$4 sm:$0xff]   ;;  %v5108_v54 = vld [vmem:[#allocation5 + $0x794] ss:$24 sps:$4 sm:$0xff]  }
 0x163   :  { %2204 = vmatprep.subr.bf16.mxu0 %v5039_v55  ;;  %v5139_v55 = vld [vmem:[#allocation8 + $0xe0] ss:$16 sps:$4 sm:$0xff]  }
 0x165   :  { %2123 = vmatpush1.bf16.msra.mxu1 %v5034_v56  ;;  %v5147_v56 = vld [vmem:[#allocation8 + $0x104] ss:$16 sps:$4 sm:$0xff]  }
 0x166   :  { %2205 = vmatpush1.bf16.msra.mxu0 %v5037_v57  ;;  %2124 = vmatprep.subr.bf16.mxu1 %v5042_v58  ;;  %v5106_v57 = vld [vmem:[#allocation5 + $0x790] ss:$24 sps:$4 sm:$0xff]   ;;  %v5114_v58 = vld [vmem:[#allocation5 + $0x7c4] ss:$24 sps:$4 sm:$0xff]  }
 0x167   :  { %2206 = vmatprep.subr.bf16.mxu0 %v5045_v59  ;;  %v5145_v59 = vld [vmem:[#allocation8 + $0x100] ss:$16 sps:$4 sm:$0xff]  }
 0x169   :  { %2125 = vmatpush1.bf16.msra.mxu1 %v5040_v60  ;;  %v5153_v60 = vld [vmem:[#allocation8 + $0x124] ss:$16 sps:$4 sm:$0xff]  }
 0x16a   :  { %2207 = vmatpush1.bf16.msra.mxu0 %v5043_v61  ;;  %2126 = vmatprep.subr.bf16.mxu1 %v5048_v62  ;;  %v5112_v61 = vld [vmem:[#allocation5 + $0x7c0] ss:$24 sps:$4 sm:$0xff]   ;;  %v5120_v62 = vld [vmem:[#allocation5 + $0x7f4] ss:$24 sps:$4 sm:$0xff]  }
 0x16b   :  { %2208 = vmatprep.subr.bf16.mxu0 %v5051_v63  ;;  %v5151_v63 = vld [vmem:[#allocation8 + $0x120] ss:$16 sps:$4 sm:$0xff]  }
 0x16d   :  { %2127 = vmatpush1.bf16.msra.mxu1 %v5046_v0  ;;  %v5159_v0 = vld [vmem:[#allocation8 + $0x144] ss:$16 sps:$4 sm:$0xff]  }
 0x16e   :  { %2209 = vmatpush1.bf16.msra.mxu0 %v5049_v1  ;;  %2128 = vmatprep.subr.bf16.mxu1 %v5054_v2  ;;  %v5118_v1 = vld [vmem:[#allocation5 + $0x7f0] ss:$24 sps:$4 sm:$0xff]   ;;  %v5126_v2 = vld [vmem:[#allocation5 + $0x824] ss:$24 sps:$4 sm:$0xff]  }
 0x16f   :  { %2210 = vmatprep.subr.bf16.mxu0 %v5057_v3  ;;  %v5157_v3 = vld [vmem:[#allocation8 + $0x140] ss:$16 sps:$4 sm:$0xff]  }
 0x171   :  { %2129 = vmatpush1.bf16.msra.mxu1 %v5052_v4  ;;  %v5165_v4 = vld [vmem:[#allocation8 + $0x164] ss:$16 sps:$4 sm:$0xff]  }
 0x172   :  { %2211 = vmatpush1.bf16.msra.mxu0 %v5055_v5  ;;  %2130 = vmatprep.subr.bf16.mxu1 %v5060_v8  ;;  %v5124_v5 = vld [vmem:[#allocation5 + $0x820] ss:$24 sps:$4 sm:$0xff]   ;;  %v5132_v8 = vld [vmem:[#allocation5 + $0x854] ss:$24 sps:$4 sm:$0xff]  }
 0x173   :  { %2212 = vmatprep.subr.bf16.mxu0 %v5063_v9  ;;  %v5163_v9 = vld [vmem:[#allocation8 + $0x160] ss:$16 sps:$4 sm:$0xff]  }
 0x175   :  { %2131 = vmatpush1.bf16.msra.mxu1 %v5058_v10  ;;  %v5171_v10 = vld [vmem:[#allocation8 + $0x184] ss:$16 sps:$4 sm:$0xff]  }
 0x176   :  { %2213 = vmatpush1.bf16.msra.mxu0 %v5061_v11  ;;  %2132 = vmatprep.subr.bf16.mxu1 %v5066_v12  ;;  %v5130_v11 = vld [vmem:[#allocation5 + $0x850] ss:$24 sps:$4 sm:$0xff]   ;;  %v5138_v12 = vld [vmem:[#allocation5 + $0x884] ss:$24 sps:$4 sm:$0xff]  }
 0x177   :  { %2214 = vmatprep.subr.bf16.mxu0 %v5069_v13  ;;  %v5169_v13 = vld [vmem:[#allocation8 + $0x180] ss:$16 sps:$4 sm:$0xff]  }
 0x179   :  { %2133 = vmatpush1.bf16.msra.mxu1 %v5064_v15  ;;  %v5177_v15 = vld [vmem:[#allocation8 + $0x1a4] ss:$16 sps:$4 sm:$0xff]  }
 0x17a   :  { %2215 = vmatpush1.bf16.msra.mxu0 %v5067_v16  ;;  %2134 = vmatprep.subr.bf16.mxu1 %v5072_v17  ;;  %v5136_v16 = vld [vmem:[#allocation5 + $0x880] ss:$24 sps:$4 sm:$0xff]   ;;  %v5144_v17 = vld [vmem:[#allocation5 + $0x8b4] ss:$24 sps:$4 sm:$0xff]  }
 0x17b   :  { %2216 = vmatprep.subr.bf16.mxu0 %v5075_v18  ;;  %v5175_v18 = vld [vmem:[#allocation8 + $0x1a0] ss:$16 sps:$4 sm:$0xff]  }
 0x17d   :  { %2135 = vmatpush1.bf16.msra.mxu1 %v5070_v19  ;;  %v5183_v19 = vld [vmem:[#allocation8 + $0x1c4] ss:$16 sps:$4 sm:$0xff]  }
 0x17e   :  { %2217 = vmatpush1.bf16.msra.mxu0 %v5073_v20  ;;  %3448 = vmatprep.subr.bf16.mxu1 %v5099_v22  ;;  %v5142_v20 = vld [vmem:[#allocation5 + $0x8b0] ss:$24 sps:$4 sm:$0xff]   ;;  %v5150_v22 = vld [vmem:[#allocation5 + $0x8e4] ss:$24 sps:$4 sm:$0xff]  }
 0x17f   :  { %2227 = vmatprep.subr.bf16.mxu0 %v5078_v21  ;;  %v5181_v21 = vld [vmem:[#allocation8 + $0x1c0] ss:$16 sps:$4 sm:$0xff]  }
 0x180   :  { %2137 = vmatmul.mubr.bf16.vlgmr.msra.gmra.mrb[4].mxu1 %v5792_v14 }
 0x181   :  { %2219 = vmatmul.mubr.bf16.vlgmr.msra.gmra.mrb[4].mxu0 %v5778_v7  ;;  %3449 = vmatpush1.bf16.msra.mxu1 %v5097_v24  ;;  %v5085_v7 = vld [vmem:[#allocation5 + $0x6a0] ss:$24 sps:$4 sm:$0xff]  }
 0x182   :  { %2228 = vmatpush1.bf16.msra.mxu0 %v5076_v23  ;;  %3450 = vmatprep.subr.bf16.mxu1 %v5105_v26  ;;  %v5189_v23 = vld [vmem:[#allocation8 + $0x1e4] ss:$16 sps:$4 sm:$0xff]   ;;  %v5156_v26 = vld [vmem:[#allocation8 + $0xc] ss:$16 sps:$4 sm:$0xff]  }
 0x183   :  { %2229 = vmatprep.subr.bf16.mxu0 %v5081_v25  ;;  %2259 = vmatprep.mubr.bf16.mxu0 %v5787_v34  ;;  %v5121_v34 = vld [vmem:[#allocation8 + $0x80] ss:$16 sps:$4 sm:$0xff]  }
 0x184   :  { %v5148_v24 = vld [vmem:[#allocation5 + $0x8e0] ss:$24 sps:$4 sm:$0xff]  }
 0x185   :  { %3451 = vmatpush1.bf16.msra.mxu1 %v5103_v28  ;;  %v5187_v25 = vld [vmem:[#allocation8 + $0x1e0] ss:$16 sps:$4 sm:$0xff]   ;;  %v5154_v28 = vld [vmem:[#allocation8 + $0x8] ss:$16 sps:$4 sm:$0xff]  }
 0x186   :  { %2230 = vmatpush1.bf16.msra.mxu0 %v5079_v27  ;;  %3452 = vmatprep.subr.bf16.mxu1 %v5111_v30  ;;  %v5222_v27 = vld [vmem:[#allocation8 + $0x204] ss:$16 sps:$4 sm:$0xff]   ;;  %v5160_v30 = vld [vmem:[#allocation8 + $0x28] ss:$16 sps:$4 sm:$0xff]  }
 0x187   :  { %2231 = vmatprep.subr.bf16.mxu0 %v5084_v29  ;;  %v5162_v29 = vld [vmem:[#allocation8 + $0x2c] ss:$16 sps:$4 sm:$0xff]  }
 0x189   :  { %3453 = vmatpush1.bf16.msra.mxu1 %v5109_v47  ;;  %v5166_v47 = vld [vmem:[#allocation8 + $0x48] ss:$16 sps:$4 sm:$0xff]  }
 0x18a   :  { %2232 = vmatpush1.bf16.msra.mxu0 %v5082_v6  ;;  %3454 = vmatprep.subr.bf16.mxu1 %v5117_v32  ;;  %v408_v6 = vlaneseq }
 0x18b   :  { %2233 = vmatprep.subr.bf16.mxu0 %v5087_v31  ;;  %v5168_v31 = vld [vmem:[#allocation8 + $0x4c] ss:$16 sps:$4 sm:$0xff]  }
 0x18c   :  { %v5810_v32 = vshrl.u32 %v408_v6, 7  ;;  %v5274_v6 = vld [vmem:[#allocation8 + $0x320] ss:$16 sps:$4 sm:$0xff]  }
 0x18d   :  { %3455 = vmatpush1.bf16.msra.mxu1 %v5115_v35 }
 0x18e   :  { %2234 = vmatpush1.bf16.msra.mxu0 %v5085_v7  ;;  %3456 = vmatprep.subr.bf16.mxu1 %v5123_v36  ;;  %v5174_v7 = vld [vmem:[#allocation8 + $0x6c] ss:$16 sps:$4 sm:$0xff]   ;;  %v410_v35 = vsub.s32 0, %v5810_v32 }
 0x18f   :  { %2235 = vmatprep.subr.bf16.mxu0 %v5090_v33  ;;  %v5172_v33 = vld [vmem:[#allocation8 + $0x68] ss:$16 sps:$4 sm:$0xff]   ;;  %v5180_v36 = vld [vmem:[#allocation8 + $0x8c] ss:$16 sps:$4 sm:$0xff]  }
 0x191   :  { %3457 = vmatpush1.bf16.msra.mxu1 %v5121_v34 }
 0x192   :  { %2236 = vmatpush1.bf16.msra.mxu0 %v5088_v51  ;;  %3458 = vmatprep.subr.bf16.mxu1 %v5129_v38  ;;  %v5813_v51 = vld [vmem:[#allocation7] sm:$0x3f] }
 0x193   :  { %2237 = vmatprep.subr.bf16.mxu0 %v5093_v37  ;;  %v5805_v43 = vpop.f32.mrb[0].mxu1  ;;  %v5178_v37 = vld [vmem:[#allocation8 + $0x88] ss:$16 sps:$4 sm:$0xff]   ;;  %v411_v34 = vrot.slane %v5813_v51, %v410_v35  ;;  %v5186_v38 = vld [vmem:[#allocation8 + $0xac] ss:$16 sps:$4 sm:$0xff]  }
 0x194   :  { %v5807_v44 = vpop.f32.mrb[1].mxu1 }
 0x195   :  { %v1937_v45 = vpop.f32.mrb[2].mxu1  ;;  %3459 = vmatpush1.bf16.msra.mxu1 %v5127_v41  ;;  %v1934_v41 = vadd.f32 %v5805_v43, %v411_v34  ;;  %v5193_v43 = vld [vmem:[#allocation8 + $0xe8] ss:$16 sps:$4 sm:$0xff]   ;;  %v5237_v34 = vld [vmem:[#allocation8 + $0x24c] ss:$16 sps:$4 sm:$0xff]  }
 0x196   :  { %2238 = vmatpush1.bf16.msra.mxu0 %v5091_v39  ;;  %v1938_v49 = vpop.f32.mrb[3].mxu1  ;;  %3460 = vmatprep.subr.bf16.mxu1 %v5135_v42  ;;  %v5192_v42 = vld [vmem:[#allocation8 + $0xcc] ss:$16 sps:$4 sm:$0xff]  }
 0x197   :  { %2239 = vmatprep.subr.bf16.mxu0 %v5096_v40  ;;  %v5184_v40 = vld [vmem:[#allocation8 + $0xa8] ss:$16 sps:$4 sm:$0xff]  }
 0x199   :  { %3461 = vmatpush1.bf16.msra.mxu1 %v5133_v48 }
 0x19a   :  { %2240 = vmatpush1.bf16.msra.mxu0 %v5094_v46  ;;  %3462 = vmatprep.subr.bf16.mxu1 %v5141_v52 }
 0x19b   :  { %2241 = vmatprep.subr.bf16.mxu0 %v5102_v50 }
 0x19d   :  { %3463 = vmatpush1.bf16.msra.mxu1 %v5139_v55 }
 0x19e   :  { %2242 = vmatpush1.bf16.msra.mxu0 %v5100_v53  ;;  %3464 = vmatprep.subr.bf16.mxu1 %v5147_v56  ;;  %v5190_v53 = vld [vmem:[#allocation8 + $0xc8] ss:$16 sps:$4 sm:$0xff]   ;;  %v5195_v56 = vld [vmem:[#allocation8 + $0xec] ss:$16 sps:$4 sm:$0xff]  }
 0x19f   :  { %2243 = vmatprep.subr.bf16.mxu0 %v5108_v54 }
 0x1a1   :  { %3465 = vmatpush1.bf16.msra.mxu1 %v5145_v59  ;;  %v5228_v59 = vld [vmem:[#allocation8 + $0x224] ss:$16 sps:$4 sm:$0xff]  }
 0x1a2   :  { %2244 = vmatpush1.bf16.msra.mxu0 %v5106_v57  ;;  %3466 = vmatprep.subr.bf16.mxu1 %v5153_v60  ;;  %v5220_v57 = vld [vmem:[#allocation8 + $0x200] ss:$16 sps:$4 sm:$0xff]  }
 0x1a3   :  { %2245 = vmatprep.subr.bf16.mxu0 %v5114_v58  ;;  %v5226_v60 = vld [vmem:[#allocation8 + $0x220] ss:$16 sps:$4 sm:$0xff]  }
 0x1a5   :  { %3467 = vmatpush1.bf16.msra.mxu1 %v5151_v63  ;;  %v5201_v63 = vld [vmem:[#allocation8 + $0x12c] ss:$16 sps:$4 sm:$0xff]  }
 0x1a6   :  { %2246 = vmatpush1.bf16.msra.mxu0 %v5112_v61  ;;  %3468 = vmatprep.subr.bf16.mxu1 %v5159_v0  ;;  %v5234_v61 = vld [vmem:[#allocation8 + $0x244] ss:$16 sps:$4 sm:$0xff]   ;;  %v5232_v0 = vld [vmem:[#allocation8 + $0x240] ss:$16 sps:$4 sm:$0xff]  }
 0x1a7   :  { %2247 = vmatprep.subr.bf16.mxu0 %v5120_v62  ;;  %v5196_v62 = vld [vmem:[#allocation8 + $0x108] ss:$16 sps:$4 sm:$0xff]  }
 0x1a9   :  { %3469 = vmatpush1.bf16.msra.mxu1 %v5157_v3  ;;  %v5204_v3 = vld [vmem:[#allocation8 + $0x14c] ss:$16 sps:$4 sm:$0xff]  }
 0x1aa   :  { %2248 = vmatpush1.bf16.msra.mxu0 %v5118_v1  ;;  %3470 = vmatprep.subr.bf16.mxu1 %v5165_v4  ;;  %v5240_v1 = vld [vmem:[#allocation8 + $0x264] ss:$16 sps:$4 sm:$0xff]   ;;  %v5238_v4 = vld [vmem:[#allocation8 + $0x260] ss:$16 sps:$4 sm:$0xff]  }
 0x1ab   :  { %2249 = vmatprep.subr.bf16.mxu0 %v5126_v2  ;;  %v5199_v2 = vld [vmem:[#allocation8 + $0x128] ss:$16 sps:$4 sm:$0xff]  }
 0x1ad   :  { %3471 = vmatpush1.bf16.msra.mxu1 %v5163_v9  ;;  %v5207_v9 = vld [vmem:[#allocation8 + $0x16c] ss:$16 sps:$4 sm:$0xff]  }
 0x1ae   :  { %2250 = vmatpush1.bf16.msra.mxu0 %v5124_v5  ;;  %3472 = vmatprep.subr.bf16.mxu1 %v5171_v10  ;;  %v5246_v5 = vld [vmem:[#allocation8 + $0x284] ss:$16 sps:$4 sm:$0xff]   ;;  %v5244_v10 = vld [vmem:[#allocation8 + $0x280] ss:$16 sps:$4 sm:$0xff]  }
 0x1af   :  { %2251 = vmatprep.subr.bf16.mxu0 %v5132_v8  ;;  %v5202_v8 = vld [vmem:[#allocation8 + $0x148] ss:$16 sps:$4 sm:$0xff]  }
 0x1b1   :  { %3473 = vmatpush1.bf16.msra.mxu1 %v5169_v13  ;;  %v5210_v13 = vld [vmem:[#allocation8 + $0x18c] ss:$16 sps:$4 sm:$0xff]  }
 0x1b2   :  { %2252 = vmatpush1.bf16.msra.mxu0 %v5130_v11  ;;  %3474 = vmatprep.subr.bf16.mxu1 %v5177_v15  ;;  %v5252_v11 = vld [vmem:[#allocation8 + $0x2a4] ss:$16 sps:$4 sm:$0xff]   ;;  %v5250_v15 = vld [vmem:[#allocation8 + $0x2a0] ss:$16 sps:$4 sm:$0xff]  }
 0x1b3   :  { %2253 = vmatprep.subr.bf16.mxu0 %v5138_v12  ;;  %v5205_v12 = vld [vmem:[#allocation8 + $0x168] ss:$16 sps:$4 sm:$0xff]  }
 0x1b5   :  { %3475 = vmatpush1.bf16.msra.mxu1 %v5175_v18  ;;  %v5213_v18 = vld [vmem:[#allocation8 + $0x1ac] ss:$16 sps:$4 sm:$0xff]  }
 0x1b6   :  { %2254 = vmatpush1.bf16.msra.mxu0 %v5136_v16  ;;  %3476 = vmatprep.subr.bf16.mxu1 %v5183_v19  ;;  %v5258_v16 = vld [vmem:[#allocation8 + $0x2c4] ss:$16 sps:$4 sm:$0xff]   ;;  %v5256_v19 = vld [vmem:[#allocation8 + $0x2c0] ss:$16 sps:$4 sm:$0xff]  }
 0x1b7   :  { %2255 = vmatprep.subr.bf16.mxu0 %v5144_v17  ;;  %v5208_v17 = vld [vmem:[#allocation8 + $0x188] ss:$16 sps:$4 sm:$0xff]  }
 0x1b9   :  { %3477 = vmatpush1.bf16.msra.mxu1 %v5181_v21  ;;  %v5211_v21 = vld [vmem:[#allocation8 + $0x1a8] ss:$16 sps:$4 sm:$0xff]  }
 0x1ba   :  { %2256 = vmatpush1.bf16.msra.mxu0 %v5142_v20  ;;  %3478 = vmatprep.subr.bf16.mxu1 %v5189_v23  ;;  %v5264_v20 = vld [vmem:[#allocation8 + $0x2e4] ss:$16 sps:$4 sm:$0xff]   ;;  %v5262_v23 = vld [vmem:[#allocation8 + $0x2e0] ss:$16 sps:$4 sm:$0xff]  }
 0x1bb   :  { %2257 = vmatprep.subr.bf16.mxu0 %v5150_v22  ;;  %v5216_v22 = vld [vmem:[#allocation8 + $0x1cc] ss:$16 sps:$4 sm:$0xff]  }
 0x1bd   :  { %3479 = vmatpush1.bf16.msra.mxu1 %v5187_v25  ;;  %v5214_v25 = vld [vmem:[#allocation8 + $0x1c8] ss:$16 sps:$4 sm:$0xff]  }
 0x1be   :  { %2258 = vmatpush1.bf16.msra.mxu0 %v5148_v24  ;;  %3489 = vmatprep.subr.bf16.mxu1 %v5222_v27  ;;  %v5270_v24 = vld [vmem:[#allocation8 + $0x304] ss:$16 sps:$4 sm:$0xff]   ;;  %v5268_v27 = vld [vmem:[#allocation8 + $0x300] ss:$16 sps:$4 sm:$0xff]  }
 0x1bf   :  { %3571 = vmatprep.subr.bf16.mxu0 %v5156_v26  ;;  %v5219_v26 = vld [vmem:[#allocation8 + $0x1ec] ss:$16 sps:$4 sm:$0xff]  }
 0x1c1   :  { %2260 = vmatmul.mubr.bf16.vlgmr.msra.gmra.mrb[4].mxu0 %v5792_v14  ;;  %v414_v14 = vsub.s32 1, %v5810_v32 }
 0x1c2   :  { %3572 = vmatpush1.bf16.msra.mxu0 %v5154_v28  ;;  %v5276_v28 = vld [vmem:[#allocation8 + $0x324] ss:$16 sps:$4 sm:$0xff]  }
 0x1c3   :  { %3573 = vmatprep.subr.bf16.mxu0 %v5162_v29  ;;  %v415_v39 = vrot.slane %v5813_v51, %v414_v14  ;;  %v5217_v29 = vld [vmem:[#allocation8 + $0x1e8] ss:$16 sps:$4 sm:$0xff]  }
 0x1c5   :  { %v1936_v45 = vadd.f32 %v5807_v44, %v415_v39  ;;  %v5198_v44 = vld [vmem:[#allocation8 + $0x10c] ss:$16 sps:$4 sm:$0xff]   ;;  %v5294_v39 = vld [vmem:[#allocation8 + $0x384] ss:$16 sps:$4 sm:$0xff]  }
 0x1c6   :  { %3574 = vmatpush1.bf16.msra.mxu0 %v5160_v30  ;;  %v5225_v30 = vld [vmem:[#allocation8 + $0x20c] ss:$16 sps:$4 sm:$0xff]  }
 0x1c7   :  { %3575 = vmatprep.subr.bf16.mxu0 %v5168_v31  ;;  %v5282_v31 = vld [vmem:[#allocation8 + $0x344] ss:$16 sps:$4 sm:$0xff]  }
 0x1ca   :  { %3576 = vmatpush1.bf16.msra.mxu0 %v5166_v47  ;;  %v5223_v47 = vld [vmem:[#allocation8 + $0x208] ss:$16 sps:$4 sm:$0xff]  }
 0x1cb   :  { %3577 = vmatprep.subr.bf16.mxu0 %v5174_v7  ;;  %v5231_v7 = vld [vmem:[#allocation8 + $0x22c] ss:$16 sps:$4 sm:$0xff]  }
 0x1ce   :  { %3578 = vmatpush1.bf16.msra.mxu0 %v5172_v33  ;;  %v5280_v33 = vld [vmem:[#allocation8 + $0x340] ss:$16 sps:$4 sm:$0xff]  }
 0x1cf   :  { %3579 = vmatprep.subr.bf16.mxu0 %v5180_v36  ;;  %v5288_v36 = vld [vmem:[#allocation8 + $0x364] ss:$16 sps:$4 sm:$0xff]  }
 0x1d2   :  { %3580 = vmatpush1.bf16.msra.mxu0 %v5178_v37  ;;  %v5229_v37 = vld [vmem:[#allocation8 + $0x228] ss:$16 sps:$4 sm:$0xff]  }
 0x1d3   :  { %3581 = vmatprep.subr.bf16.mxu0 %v5186_v38  ;;  %v5286_v38 = vld [vmem:[#allocation8 + $0x360] ss:$16 sps:$4 sm:$0xff]  }
 0x1d4   :  { %v2015_v46 = vpop.f32.mrb[0].mxu0 }
 0x1d5   :  { %v4625_v48 = vadd.f32 %v2015_v46, %v1934_v41  ;;  %v2017_v49 = vpop.f32.mrb[1].mxu0  ;;  %v5243_v41 = vld [vmem:[#allocation8 + $0x26c] ss:$16 sps:$4 sm:$0xff]   ;;  %v5241_v46 = vld [vmem:[#allocation8 + $0x268] ss:$16 sps:$4 sm:$0xff]  }
 0x1d6   :  { %v4627_v50 = vadd.f32 %v2017_v49, %v1936_v45  ;;  %v2019_v52 = vpop.f32.mrb[2].mxu0  ;;  %3582 = vmatpush1.bf16.msra.mxu0 %v5184_v40  ;;  %v5235_v40 = vld [vmem:[#allocation8 + $0x248] ss:$16 sps:$4 sm:$0xff]   ;;  %v5300_v45 = vld [vmem:[#allocation8 + $0x3a4] ss:$16 sps:$4 sm:$0xff]  }
 0x1d7   :  { %v2020_v54 = vpop.f32.mrb[3].mxu0  ;;  %3583 = vmatprep.subr.bf16.mxu0 %v5192_v42  ;;  %v5824_v58 = vpack.c.bf16 %v4625_v48, %v4625_v48  ;;  %v5292_v42 = vld [vmem:[#allocation8 + $0x380] ss:$16 sps:$4 sm:$0xff]   ;;  %v5249_v48 = vld [vmem:[#allocation8 + $0x28c] ss:$16 sps:$4 sm:$0xff]  }
 0x1d8   :  { %v2269_v55 = vpack.c.bf16 %v4627_v50, %v4627_v50  ;;  %v5298_v49 = vld [vmem:[#allocation8 + $0x3a0] ss:$16 sps:$4 sm:$0xff]   ;;  %v5306_v50 = vld [vmem:[#allocation8 + $0x3c4] ss:$16 sps:$4 sm:$0xff]   ;;  %v5247_v52 = vld [vmem:[#allocation8 + $0x288] ss:$16 sps:$4 sm:$0xff]  }
 0x1d9   :  { %v5304_v54 = vld [vmem:[#allocation8 + $0x3c0] ss:$16 sps:$4 sm:$0xff]  }
 0x1da   :  { %3480 = vmatprep.mubr.bf16.mxu1 %v2269_v55  ;;  %3584 = vmatpush1.bf16.msra.mxu0 %v5190_v53  ;;  %v5255_v53 = vld [vmem:[#allocation8 + $0x2ac] ss:$16 sps:$4 sm:$0xff]  }
 0x1db   :  { %3603 = vmatprep.mubr.bf16.mxu0 %v2269_v55  ;;  %3481 = vmatmul.mubr.bf16.vlgmr.msra.gmra.mrb[8].mxu1 %v5824_v58  ;;  %v5312_v55 = vld [vmem:[#allocation8 + $0x3e4] ss:$16 sps:$4 sm:$0xff]  }
 0x1dc   :  { %3585 = vmatprep.subr.bf16.mxu0 %v5195_v56  ;;  %3490 = vmatpush1.bf16.msra.mxu1 %v5220_v57  ;;  %v5253_v56 = vld [vmem:[#allocation8 + $0x2a8] ss:$16 sps:$4 sm:$0xff]   ;;  %v5261_v57 = vld [vmem:[#allocation8 + $0x2cc] ss:$16 sps:$4 sm:$0xff]  }
 0x1dd   :  { %3491 = vmatprep.subr.bf16.mxu1 %v5228_v59  ;;  %v5318_v59 = vld [vmem:[#allocation8 + $0x404] ss:$16 sps:$4 sm:$0xff]  }
 0x1de   :  { %3586 = vmatpush1.bf16.msra.mxu0 %v5193_v43  ;;  %v5259_v43 = vld [vmem:[#allocation8 + $0x2c8] ss:$16 sps:$4 sm:$0xff]  }
 0x1df   :  { %3587 = vmatprep.subr.bf16.mxu0 %v5198_v44  ;;  %v5267_v44 = vld [vmem:[#allocation8 + $0x2ec] ss:$16 sps:$4 sm:$0xff]  }
 0x1e0   :  { %3492 = vmatpush1.bf16.msra.mxu1 %v5226_v60  ;;  %v5265_v60 = vld [vmem:[#allocation8 + $0x2e8] ss:$16 sps:$4 sm:$0xff]  }
 0x1e1   :  { %3493 = vmatprep.subr.bf16.mxu1 %v5234_v61  ;;  %v5273_v61 = vld [vmem:[#allocation8 + $0x30c] ss:$16 sps:$4 sm:$0xff]  }
 0x1e2   :  { %3588 = vmatpush1.bf16.msra.mxu0 %v5196_v62  ;;  %v5271_v62 = vld [vmem:[#allocation8 + $0x308] ss:$16 sps:$4 sm:$0xff]  }
 0x1e3   :  { %3589 = vmatprep.subr.bf16.mxu0 %v5201_v63  ;;  %v5279_v63 = vld [vmem:[#allocation8 + $0x32c] ss:$16 sps:$4 sm:$0xff]  }
 0x1e4   :  { %3494 = vmatpush1.bf16.msra.mxu1 %v5232_v0  ;;  %v5277_v0 = vld [vmem:[#allocation8 + $0x328] ss:$16 sps:$4 sm:$0xff]  }
 0x1e5   :  { %3495 = vmatprep.subr.bf16.mxu1 %v5240_v1  ;;  %v5285_v1 = vld [vmem:[#allocation8 + $0x34c] ss:$16 sps:$4 sm:$0xff]  }
 0x1e6   :  { %3590 = vmatpush1.bf16.msra.mxu0 %v5199_v2  ;;  %v5283_v2 = vld [vmem:[#allocation8 + $0x348] ss:$16 sps:$4 sm:$0xff]  }
 0x1e7   :  { %3591 = vmatprep.subr.bf16.mxu0 %v5204_v3  ;;  %v5291_v3 = vld [vmem:[#allocation8 + $0x36c] ss:$16 sps:$4 sm:$0xff]  }
 0x1e8   :  { %3496 = vmatpush1.bf16.msra.mxu1 %v5238_v4  ;;  %v5289_v4 = vld [vmem:[#allocation8 + $0x368] ss:$16 sps:$4 sm:$0xff]  }
 0x1e9   :  { %3497 = vmatprep.subr.bf16.mxu1 %v5246_v5  ;;  %v5297_v5 = vld [vmem:[#allocation8 + $0x38c] ss:$16 sps:$4 sm:$0xff]  }
 0x1ea   :  { %3592 = vmatpush1.bf16.msra.mxu0 %v5202_v8  ;;  %v5295_v8 = vld [vmem:[#allocation8 + $0x388] ss:$16 sps:$4 sm:$0xff]  }
 0x1eb   :  { %3593 = vmatprep.subr.bf16.mxu0 %v5207_v9  ;;  %v5303_v9 = vld [vmem:[#allocation8 + $0x3ac] ss:$16 sps:$4 sm:$0xff]  }
 0x1ec   :  { %3498 = vmatpush1.bf16.msra.mxu1 %v5244_v10  ;;  %v5301_v10 = vld [vmem:[#allocation8 + $0x3a8] ss:$16 sps:$4 sm:$0xff]  }
 0x1ed   :  { %3499 = vmatprep.subr.bf16.mxu1 %v5252_v11  ;;  %v5309_v11 = vld [vmem:[#allocation8 + $0x3cc] ss:$16 sps:$4 sm:$0xff]  }
 0x1ee   :  { %3594 = vmatpush1.bf16.msra.mxu0 %v5205_v12  ;;  %v5307_v12 = vld [vmem:[#allocation8 + $0x3c8] ss:$16 sps:$4 sm:$0xff]  }
 0x1ef   :  { %3595 = vmatprep.subr.bf16.mxu0 %v5210_v13  ;;  %v5315_v13 = vld [vmem:[#allocation8 + $0x3ec] ss:$16 sps:$4 sm:$0xff]  }
 0x1f0   :  { %3500 = vmatpush1.bf16.msra.mxu1 %v5250_v15  ;;  %v5313_v15 = vld [vmem:[#allocation8 + $0x3e8] ss:$16 sps:$4 sm:$0xff]  }
 0x1f1   :  { %3501 = vmatprep.subr.bf16.mxu1 %v5258_v16  ;;  %v5321_v16 = vld [vmem:[#allocation8 + $0x40c] ss:$16 sps:$4 sm:$0xff]  }
 0x1f2   :  { %3596 = vmatpush1.bf16.msra.mxu0 %v5208_v17  ;;  %v418_v17 = vsub.s32 2, %v5810_v32 }
 0x1f3   :  { %3597 = vmatprep.subr.bf16.mxu0 %v5213_v18  ;;  %v422_v18 = vsub.s32 3, %v5810_v32 }
 0x1f4   :  { %3502 = vmatpush1.bf16.msra.mxu1 %v5256_v19  ;;  %v419_v19 = vrot.slane %v5813_v51, %v418_v17 }
 0x1f5   :  { %3503 = vmatprep.subr.bf16.mxu1 %v5264_v20  ;;  %v423_v20 = vrot.slane %v5813_v51, %v422_v18 }
 0x1f6   :  { %3598 = vmatpush1.bf16.msra.mxu0 %v5211_v21 }
 0x1f7   :  { %3599 = vmatprep.subr.bf16.mxu0 %v5216_v22 }
 0x1f8   :  { %3504 = vmatpush1.bf16.msra.mxu1 %v5262_v23 }
 0x1f9   :  { %3505 = vmatprep.subr.bf16.mxu1 %v5270_v24 }
 0x1fa   :  { %3600 = vmatpush1.bf16.msra.mxu0 %v5214_v25 }
 0x1fb   :  { %3601 = vmatprep.subr.bf16.mxu0 %v5219_v26 }
 0x1fc   :  { %3506 = vmatpush1.bf16.msra.mxu1 %v5268_v27 }
 0x1fd   :  { %3507 = vmatprep.subr.bf16.mxu1 %v5276_v28  ;;  %v5316_v28 = vld [vmem:[#allocation8 + $0x400] ss:$16 sps:$4 sm:$0xff]  }
 0x1fe   :  { %3602 = vmatpush1.bf16.msra.mxu0 %v5217_v29  ;;  %v5319_v29 = vld [vmem:[#allocation8 + $0x408] ss:$16 sps:$4 sm:$0xff]  }
 0x1ff   :  { %3612 = vmatprep.subr.bf16.mxu0 %v5225_v30 }
 0x200   :  { %3508 = vmatpush1.bf16.msra.mxu1 %v5274_v6  ;;  %v5324_v6 = vld [vmem:[#allocation8 + $0x424] ss:$16 sps:$4 sm:$0xff]  }
 0x201   :  { %3604 = vmatmul.mubr.bf16.vlgmr.msra.gmra.mrb[8].mxu0 %v5824_v58  ;;  %3509 = vmatprep.subr.bf16.mxu1 %v5282_v31  ;;  %v5310_v58 = vld [vmem:[#allocation8 + $0x3e0] ss:$16 sps:$4 sm:$0xff]   ;;  %v5327_v31 = vld [vmem:[#allocation8 + $0x42c] ss:$16 sps:$4 sm:$0xff]  }
 0x202   :  { %3613 = vmatpush1.bf16.msra.mxu0 %v5223_v47  ;;  %v5322_v47 = vld [vmem:[#allocation8 + $0x420] ss:$16 sps:$4 sm:$0xff]  }
 0x203   :  { %3614 = vmatprep.subr.bf16.mxu0 %v5231_v7  ;;  %v5325_v7 = vld [vmem:[#allocation8 + $0x428] ss:$16 sps:$4 sm:$0xff]  }
 0x204   :  { %3510 = vmatpush1.bf16.msra.mxu1 %v5280_v33  ;;  %v5330_v33 = vld [vmem:[#allocation8 + $0x444] ss:$16 sps:$4 sm:$0xff]  }
 0x205   :  { %3511 = vmatprep.subr.bf16.mxu1 %v5288_v36  ;;  %v5333_v36 = vld [vmem:[#allocation8 + $0x44c] ss:$16 sps:$4 sm:$0xff]  }
 0x206   :  { %3615 = vmatpush1.bf16.msra.mxu0 %v5229_v37  ;;  %v5328_v37 = vld [vmem:[#allocation8 + $0x440] ss:$16 sps:$4 sm:$0xff]  }
 0x207   :  { %3616 = vmatprep.subr.bf16.mxu0 %v5237_v34  ;;  %v5331_v34 = vld [vmem:[#allocation8 + $0x448] ss:$16 sps:$4 sm:$0xff]  }
 0x208   :  { %3512 = vmatpush1.bf16.msra.mxu1 %v5286_v38  ;;  %v5336_v38 = vld [vmem:[#allocation8 + $0x464] ss:$16 sps:$4 sm:$0xff]  }
 0x209   :  { %3513 = vmatprep.subr.bf16.mxu1 %v5294_v39  ;;  %v5339_v39 = vld [vmem:[#allocation8 + $0x46c] ss:$16 sps:$4 sm:$0xff]  }
 0x20a   :  { %3617 = vmatpush1.bf16.msra.mxu0 %v5235_v40  ;;  %v5334_v40 = vld [vmem:[#allocation8 + $0x460] ss:$16 sps:$4 sm:$0xff]  }
 0x20b   :  { %3618 = vmatprep.subr.bf16.mxu0 %v5243_v41  ;;  %v5337_v41 = vld [vmem:[#allocation8 + $0x468] ss:$16 sps:$4 sm:$0xff]  }
 0x20c   :  { %3514 = vmatpush1.bf16.msra.mxu1 %v5292_v42  ;;  %v5342_v42 = vld [vmem:[#allocation8 + $0x484] ss:$16 sps:$4 sm:$0xff]  }
 0x20d   :  { %3515 = vmatprep.subr.bf16.mxu1 %v5300_v45  ;;  %v5345_v45 = vld [vmem:[#allocation8 + $0x48c] ss:$16 sps:$4 sm:$0xff]  }
 0x20e   :  { %3619 = vmatpush1.bf16.msra.mxu0 %v5241_v46  ;;  %v5340_v46 = vld [vmem:[#allocation8 + $0x480] ss:$16 sps:$4 sm:$0xff]  }
 0x20f   :  { %3620 = vmatprep.subr.bf16.mxu0 %v5249_v48  ;;  %v5343_v48 = vld [vmem:[#allocation8 + $0x488] ss:$16 sps:$4 sm:$0xff]  }
 0x210   :  { %3516 = vmatpush1.bf16.msra.mxu1 %v5298_v49  ;;  %v5348_v49 = vld [vmem:[#allocation8 + $0x4a4] ss:$16 sps:$4 sm:$0xff]  }
 0x211   :  { %3517 = vmatprep.subr.bf16.mxu1 %v5306_v50  ;;  %v5351_v50 = vld [vmem:[#allocation8 + $0x4ac] ss:$16 sps:$4 sm:$0xff]  }
 0x212   :  { %3621 = vmatpush1.bf16.msra.mxu0 %v5247_v52  ;;  %v5346_v52 = vld [vmem:[#allocation8 + $0x4a0] ss:$16 sps:$4 sm:$0xff]  }
 0x213   :  { %3622 = vmatprep.subr.bf16.mxu0 %v5255_v53  ;;  %v5349_v53 = vld [vmem:[#allocation8 + $0x4a8] ss:$16 sps:$4 sm:$0xff]  }
 0x214   :  { %3518 = vmatpush1.bf16.msra.mxu1 %v5304_v54  ;;  %v5354_v54 = vld [vmem:[#allocation8 + $0x4c4] ss:$16 sps:$4 sm:$0xff]  }
 0x215   :  { %3519 = vmatprep.subr.bf16.mxu1 %v5312_v55  ;;  %v5357_v55 = vld [vmem:[#allocation8 + $0x4cc] ss:$16 sps:$4 sm:$0xff]  }
 0x216   :  { %3623 = vmatpush1.bf16.msra.mxu0 %v5253_v56  ;;  %v5352_v56 = vld [vmem:[#allocation8 + $0x4c0] ss:$16 sps:$4 sm:$0xff]  }
 0x217   :  { %3624 = vmatprep.subr.bf16.mxu0 %v5261_v57  ;;  %v5355_v57 = vld [vmem:[#allocation8 + $0x4c8] ss:$16 sps:$4 sm:$0xff]  }
 0x218   :  { %3520 = vmatpush1.bf16.msra.mxu1 %v5310_v58  ;;  %v5360_v58 = vld [vmem:[#allocation8 + $0x4e4] ss:$16 sps:$4 sm:$0xff]  }
 0x219   :  { %3530 = vmatprep.subr.bf16.mxu1 %v5318_v59  ;;  %v5363_v59 = vld [vmem:[#allocation8 + $0x4ec] ss:$16 sps:$4 sm:$0xff]  }
 0x21a   :  { %3625 = vmatpush1.bf16.msra.mxu0 %v5259_v43  ;;  %v5358_v43 = vld [vmem:[#allocation8 + $0x4e0] ss:$16 sps:$4 sm:$0xff]  }
 0x21b   :  { %3626 = vmatprep.subr.bf16.mxu0 %v5267_v44  ;;  %v5361_v44 = vld [vmem:[#allocation8 + $0x4e8] ss:$16 sps:$4 sm:$0xff]  }
 0x21e   :  { %3627 = vmatpush1.bf16.msra.mxu0 %v5265_v60  ;;  %v5366_v60 = vld [vmem:[#allocation8 + $0x504] ss:$16 sps:$4 sm:$0xff]  }
 0x21f   :  { %3628 = vmatprep.subr.bf16.mxu0 %v5273_v61  ;;  %v5369_v61 = vld [vmem:[#allocation8 + $0x50c] ss:$16 sps:$4 sm:$0xff]  }
 0x222   :  { %3629 = vmatpush1.bf16.msra.mxu0 %v5271_v62  ;;  %v5364_v62 = vld [vmem:[#allocation8 + $0x500] ss:$16 sps:$4 sm:$0xff]  }
 0x223   :  { %3630 = vmatprep.subr.bf16.mxu0 %v5279_v63  ;;  %v5367_v63 = vld [vmem:[#allocation8 + $0x508] ss:$16 sps:$4 sm:$0xff]  }
 0x226   :  { %3631 = vmatpush1.bf16.msra.mxu0 %v5277_v0  ;;  %v5372_v0 = vld [vmem:[#allocation8 + $0x524] ss:$16 sps:$4 sm:$0xff]  }
 0x227   :  { %3632 = vmatprep.subr.bf16.mxu0 %v5285_v1  ;;  %v5375_v1 = vld [vmem:[#allocation8 + $0x52c] ss:$16 sps:$4 sm:$0xff]  }
 0x22a   :  { %3633 = vmatpush1.bf16.msra.mxu0 %v5283_v2  ;;  %v5370_v2 = vld [vmem:[#allocation8 + $0x520] ss:$16 sps:$4 sm:$0xff]  }
 0x22b   :  { %3634 = vmatprep.subr.bf16.mxu0 %v5291_v3  ;;  %v5373_v3 = vld [vmem:[#allocation8 + $0x528] ss:$16 sps:$4 sm:$0xff]  }
 0x22e   :  { %3635 = vmatpush1.bf16.msra.mxu0 %v5289_v4  ;;  %v5378_v4 = vld [vmem:[#allocation8 + $0x544] ss:$16 sps:$4 sm:$0xff]  }
 0x22f   :  { %3636 = vmatprep.subr.bf16.mxu0 %v5297_v5  ;;  %v5381_v5 = vld [vmem:[#allocation8 + $0x54c] ss:$16 sps:$4 sm:$0xff]  }
 0x232   :  { %3637 = vmatpush1.bf16.msra.mxu0 %v5295_v8  ;;  %v5376_v8 = vld [vmem:[#allocation8 + $0x540] ss:$16 sps:$4 sm:$0xff]  }
 0x233   :  { %3638 = vmatprep.subr.bf16.mxu0 %v5303_v9  ;;  %v5379_v9 = vld [vmem:[#allocation8 + $0x548] ss:$16 sps:$4 sm:$0xff]  }
 0x236   :  { %3639 = vmatpush1.bf16.msra.mxu0 %v5301_v10  ;;  %v5384_v10 = vld [vmem:[#allocation8 + $0x564] ss:$16 sps:$4 sm:$0xff]  }
 0x237   :  { %3640 = vmatprep.subr.bf16.mxu0 %v5309_v11  ;;  %v5387_v11 = vld [vmem:[#allocation8 + $0x56c] ss:$16 sps:$4 sm:$0xff]  }
 0x23a   :  { %3641 = vmatpush1.bf16.msra.mxu0 %v5307_v12  ;;  %v5382_v12 = vld [vmem:[#allocation8 + $0x560] ss:$16 sps:$4 sm:$0xff]  }
 0x23b   :  { %3642 = vmatprep.subr.bf16.mxu0 %v5315_v13  ;;  %v5385_v13 = vld [vmem:[#allocation8 + $0x568] ss:$16 sps:$4 sm:$0xff]  }
 0x23e   :  { %3643 = vmatpush1.bf16.msra.mxu0 %v5313_v15  ;;  %v5390_v15 = vld [vmem:[#allocation8 + $0x584] ss:$16 sps:$4 sm:$0xff]  }
 0x23f   :  { %3653 = vmatprep.subr.bf16.mxu0 %v5321_v16  ;;  %v5393_v16 = vld [vmem:[#allocation8 + $0x58c] ss:$16 sps:$4 sm:$0xff]  }
 0x253   :  { %v2138_v21 = vpop.f32.mrb[4].mxu1 }
 0x254   :  { %v4628_v22 = vadd.f32 %v2138_v21, %v419_v19  ;;  %v2140_v23 = vpop.f32.mrb[5].mxu1  ;;  %v5388_v19 = vld [vmem:[#allocation8 + $0x580] ss:$16 sps:$4 sm:$0xff]   ;;  %v5396_v21 = vld [vmem:[#allocation8 + $0x5a4] ss:$16 sps:$4 sm:$0xff]  }
 0x255   :  { %v4629_v24 = vadd.f32 %v2140_v23, %v423_v20  ;;  %v2142_v25 = vpop.f32.mrb[6].mxu1  ;;  %v5391_v20 = vld [vmem:[#allocation8 + $0x588] ss:$16 sps:$4 sm:$0xff]   ;;  %v5394_v23 = vld [vmem:[#allocation8 + $0x5a0] ss:$16 sps:$4 sm:$0xff]  }
 0x256   :  { %v2143_v26 = vpop.f32.mrb[7].mxu1  ;;  %v2270_v30 = vpack.c.bf16 %v4628_v22, %v4628_v22  ;;  %v5399_v22 = vld [vmem:[#allocation8 + $0x5ac] ss:$16 sps:$4 sm:$0xff]   ;;  %v5402_v25 = vld [vmem:[#allocation8 + $0x5c4] ss:$16 sps:$4 sm:$0xff]  }
 0x257   :  { %v2271_v27 = vpack.c.bf16 %v4629_v24, %v4629_v24  ;;  %v5397_v24 = vld [vmem:[#allocation8 + $0x5a8] ss:$16 sps:$4 sm:$0xff]   ;;  %v5405_v26 = vld [vmem:[#allocation8 + $0x5cc] ss:$16 sps:$4 sm:$0xff]  }
 0x259   :  { %3521 = vmatprep.mubr.bf16.mxu1 %v2271_v27  ;;  %3644 = vmatprep.mubr.bf16.mxu0 %v2271_v27  ;;  %v426_v27 = vsub.s32 4, %v5810_v32 }
 0x25a   :  { %3522 = vmatmul.mubr.bf16.vlgmr.msra.gmra.mrb[8].mxu1 %v2270_v30  ;;  %3645 = vmatmul.mubr.bf16.vlgmr.msra.gmra.mrb[8].mxu0 %v2270_v30  ;;  %v5403_v30 = vld [vmem:[#allocation8 + $0x5c8] ss:$16 sps:$4 sm:$0xff]  }
 0x25b   :  { %3531 = vmatpush1.bf16.msra.mxu1 %v5316_v28  ;;  %3654 = vmatpush1.bf16.msra.mxu0 %v5319_v29  ;;  %v430_v28 = vsub.s32 5, %v5810_v32  ;;  %v5400_v29 = vld [vmem:[#allocation8 + $0x5c0] ss:$16 sps:$4 sm:$0xff]  }
 0x25c   :  { %3532 = vmatprep.subr.bf16.mxu1 %v5324_v6  ;;  %3655 = vmatprep.subr.bf16.mxu0 %v5327_v31  ;;  %v427_v6 = vrot.slane %v5813_v51, %v426_v27  ;;  %v5408_v31 = vld [vmem:[#allocation8 + $0x5e4] ss:$16 sps:$4 sm:$0xff]   ;;  %v5438_v27 = vld [vmem:[#allocation11 + $0xe8] sm:$0xff]  }
 0x25f   :  { %3533 = vmatpush1.bf16.msra.mxu1 %v5322_v47  ;;  %3656 = vmatpush1.bf16.msra.mxu0 %v5325_v7  ;;  %v5411_v47 = vld [vmem:[#allocation8 + $0x5ec] ss:$16 sps:$4 sm:$0xff]   ;;  %v431_v7 = vrot.slane %v5813_v51, %v430_v28 }
 0x260   :  { %3534 = vmatprep.subr.bf16.mxu1 %v5330_v33  ;;  %3657 = vmatprep.subr.bf16.mxu0 %v5333_v36  ;;  %v5406_v36 = vld [vmem:[#allocation8 + $0x5e0] ss:$16 sps:$4 sm:$0xff]  }
 0x261   :  { %v5414_v51 = vld [vmem:[#allocation11 + $0x48] sm:$0xff]  }
 0x262   :  { %v5439_v28 = vld [vmem:[#allocation11 + $0xa8] sm:$0xff]  }
 0x263   :  { %3535 = vmatpush1.bf16.msra.mxu1 %v5328_v37  ;;  %3658 = vmatpush1.bf16.msra.mxu0 %v5331_v34  ;;  %v5409_v37 = vld [vmem:[#allocation8 + $0x5e8] ss:$16 sps:$4 sm:$0xff]  }
 0x264   :  { %3536 = vmatprep.subr.bf16.mxu1 %v5336_v38  ;;  %3659 = vmatprep.subr.bf16.mxu0 %v5339_v39  ;;  %v5412_v39 = vld [vmem:[#allocation11 + $0x40] sm:$0xff]  }
 0x267   :  { %3537 = vmatpush1.bf16.msra.mxu1 %v5334_v40  ;;  %3660 = vmatpush1.bf16.msra.mxu0 %v5337_v41 }
 0x268   :  { %3538 = vmatprep.subr.bf16.mxu1 %v5342_v42  ;;  %3661 = vmatprep.subr.bf16.mxu0 %v5345_v45 }
 0x26b   :  { %3539 = vmatpush1.bf16.msra.mxu1 %v5340_v46  ;;  %3662 = vmatpush1.bf16.msra.mxu0 %v5343_v48  ;;  %v5413_v46 = vld [vmem:[#allocation11] sm:$0xff]  }
 0x26c   :  { %3540 = vmatprep.subr.bf16.mxu1 %v5348_v49  ;;  %3663 = vmatprep.subr.bf16.mxu0 %v5351_v50  ;;  %v5415_v49 = vld [vmem:[#allocation11 + $0x8] sm:$0xff]   ;;  %v5416_v50 = vld [vmem:[#allocation11 + $0x50] sm:$0xff]  }
 0x26f   :  { %3541 = vmatpush1.bf16.msra.mxu1 %v5346_v52  ;;  %3664 = vmatpush1.bf16.msra.mxu0 %v5349_v53  ;;  %v5417_v52 = vld [vmem:[#allocation11 + $0x10] sm:$0xff]   ;;  %v5418_v53 = vld [vmem:[#allocation11 + $0x58] sm:$0xff]  }
 0x270   :  { %3542 = vmatprep.subr.bf16.mxu1 %v5354_v54  ;;  %3665 = vmatprep.subr.bf16.mxu0 %v5357_v55  ;;  %v5419_v54 = vld [vmem:[#allocation11 + $0x18] sm:$0xff]   ;;  %v5420_v55 = vld [vmem:[#allocation11 + $0x60] sm:$0xff]  }
 0x273   :  { %3543 = vmatpush1.bf16.msra.mxu1 %v5352_v56  ;;  %3666 = vmatpush1.bf16.msra.mxu0 %v5355_v57  ;;  %v5421_v56 = vld [vmem:[#allocation11 + $0x20] sm:$0xff]   ;;  %v5422_v57 = vld [vmem:[#allocation11 + $0x68] sm:$0xff]  }
 0x274   :  { %3544 = vmatprep.subr.bf16.mxu1 %v5360_v58  ;;  %3667 = vmatprep.subr.bf16.mxu0 %v5363_v59  ;;  %v5423_v58 = vld [vmem:[#allocation11 + $0x28] sm:$0xff]   ;;  %v5424_v59 = vld [vmem:[#allocation11 + $0x70] sm:$0xff]  }
 0x277   :  { %3545 = vmatpush1.bf16.msra.mxu1 %v5358_v43  ;;  %3668 = vmatpush1.bf16.msra.mxu0 %v5361_v44  ;;  %v5425_v43 = vld [vmem:[#allocation11 + $0x30] sm:$0xff]   ;;  %v5426_v44 = vld [vmem:[#allocation11 + $0x78] sm:$0xff]  }
 0x278   :  { %3546 = vmatprep.subr.bf16.mxu1 %v5366_v60  ;;  %3669 = vmatprep.subr.bf16.mxu0 %v5369_v61  ;;  %v5427_v60 = vld [vmem:[#allocation11 + $0x38] sm:$0xff]   ;;  %v5428_v61 = vld [vmem:[#allocation11 + $0xc0] sm:$0xff]  }
 0x27b   :  { %3547 = vmatpush1.bf16.msra.mxu1 %v5364_v62  ;;  %3670 = vmatpush1.bf16.msra.mxu0 %v5367_v63  ;;  %v2466_v62 = vld [vmem:[#allocation10] sm:$0xf] }
 0x27c   :  { %3548 = vmatprep.subr.bf16.mxu1 %v5372_v0  ;;  %3671 = vmatprep.subr.bf16.mxu0 %v5375_v1  ;;  %v2471_v63 = vrot.slane %v2466_v62, %v410_v35  ;;  %v2475_v0 = vrot.slane %v2466_v62, %v414_v14  ;;  %v2483_v1 = vrot.slane %v2466_v62, %v422_v18  ;;  %v5431_v14 = vld [vmem:[#allocation11 + $0x88] sm:$0xff]   ;;  %v5432_v18 = vld [vmem:[#allocation11 + $0xd0] sm:$0xff]  }
 0x27f   :  { %3549 = vmatpush1.bf16.msra.mxu1 %v5370_v2  ;;  %3672 = vmatpush1.bf16.msra.mxu0 %v5373_v3 }
 0x280   :  { %3550 = vmatprep.subr.bf16.mxu1 %v5378_v4  ;;  %3673 = vmatprep.subr.bf16.mxu0 %v5381_v5 }
 0x283   :  { %3551 = vmatpush1.bf16.msra.mxu1 %v5376_v8  ;;  %3674 = vmatpush1.bf16.msra.mxu0 %v5379_v9 }
 0x284   :  { %3552 = vmatprep.subr.bf16.mxu1 %v5384_v10  ;;  %3675 = vmatprep.subr.bf16.mxu0 %v5387_v11 }
 0x287   :  { %3553 = vmatpush1.bf16.msra.mxu1 %v5382_v12  ;;  %3676 = vmatpush1.bf16.msra.mxu0 %v5385_v13 }
 0x288   :  { %3554 = vmatprep.subr.bf16.mxu1 %v5390_v15  ;;  %3677 = vmatprep.subr.bf16.mxu0 %v5393_v16 }
 0x28b   :  { %3555 = vmatpush1.bf16.msra.mxu1 %v5388_v19  ;;  %3678 = vmatpush1.bf16.msra.mxu0 %v5391_v20  ;;  %v5429_v19 = vld [vmem:[#allocation11 + $0x80] sm:$0xff]   ;;  %v5430_v20 = vld [vmem:[#allocation11 + $0xc8] sm:$0xff]  }
 0x28c   :  { %3556 = vmatprep.subr.bf16.mxu1 %v5396_v21  ;;  %3679 = vmatprep.subr.bf16.mxu0 %v5399_v22  ;;  %v5433_v22 = vld [vmem:[#allocation11 + $0x90] sm:$0xff]  }
 0x28f   :  { %3557 = vmatpush1.bf16.msra.mxu1 %v5394_v23  ;;  %3680 = vmatpush1.bf16.msra.mxu0 %v5397_v24  ;;  %v5434_v23 = vld [vmem:[#allocation11 + $0xd8] sm:$0xff]  }
 0x290   :  { %3558 = vmatprep.subr.bf16.mxu1 %v5402_v25  ;;  %3681 = vmatprep.subr.bf16.mxu0 %v5405_v26  ;;  %v5435_v24 = vld [vmem:[#allocation11 + $0x98] sm:$0xff]   ;;  %v5436_v25 = vld [vmem:[#allocation11 + $0xe0] sm:$0xff]  }
 0x291   :  { %v5437_v26 = vld [vmem:[#allocation11 + $0xa0] sm:$0xff]  }
 0x293   :  { %3559 = vmatpush1.bf16.msra.mxu1 %v5400_v29  ;;  %3682 = vmatpush1.bf16.msra.mxu0 %v5403_v30  ;;  %v5440_v29 = vld [vmem:[#allocation11 + $0xf0] sm:$0xff]  }
 0x294   :  { %v2261_v33 = vpop.f32.mrb[4].mxu0  ;;  %3560 = vmatprep.subr.bf16.mxu1 %v5408_v31  ;;  %3683 = vmatprep.subr.bf16.mxu0 %v5411_v47  ;;  %v5441_v30 = vld [vmem:[#allocation11 + $0xb0] sm:$0xff]   ;;  %v5442_v31 = vld [vmem:[#allocation11 + $0xf8] sm:$0xff]  }
 0x295   :  { %v4630_v34 = vadd.f32 %v2261_v33, %v427_v6  ;;  %v2263_v38 = vpop.f32.mrb[5].mxu0  ;;  %v2479_v6 = vrot.slane %v2466_v62, %v418_v17  ;;  %v5443_v47 = vld [vmem:[#allocation11 + $0xb8] sm:$0xff]  }
 0x296   :  { %v4631_v40 = vadd.f32 %v2263_v38, %v431_v7  ;;  %v2265_v41 = vpop.f32.mrb[6].mxu0 }
 0x297   :  { %v2266_v42 = vpop.f32.mrb[7].mxu0  ;;  %3561 = vmatpush1.bf16.msra.mxu1 %v5406_v36  ;;  %3684 = vmatpush1.bf16.msra.mxu0 %v5409_v37  ;;  %v2272_v48 = vpack.c.bf16 %v4630_v34, %v4630_v34 }
 0x298   :  { %v2273_v45 = vpack.c.bf16 %v4631_v40, %v4631_v40  ;;  %4580 = vmatprep.subr.bf16.mxu1 %v5412_v39  ;;  %v4547_v40 = vld [vmem:[#allocation13] ss:$0 sm:$0xff] }
 0x29a   :  { %3562 = vmatprep.mubr.bf16.mxu1 %v2273_v45  ;;  %3685 = vmatprep.mubr.bf16.mxu0 %v2273_v45 }
 0x29b   :  { %3563 = vmatmul.mubr.bf16.vlgmr.msra.gmra.mrb[8].mxu1 %v2272_v48  ;;  %3686 = vmatmul.mubr.bf16.vlgmr.msra.gmra.mrb[8].mxu0 %v2272_v48 }
 0x29c   :  { %4581 = vmatpush3.bf16.msra.mxu1 %v5413_v46 }
 0x29d   :  { %4582 = vmatprep.subr.bf16.mxu1 %v5414_v51 }
 0x2a0   :  { %4583 = vmatpush3.bf16.msra.mxu1 %v5415_v49 }
 0x2a1   :  { %4584 = vmatprep.subr.bf16.mxu1 %v5416_v50 }
 0x2a4   :  { %4585 = vmatpush3.bf16.msra.mxu1 %v5417_v52 }
 0x2a5   :  { %4586 = vmatprep.subr.bf16.mxu1 %v5418_v53 }
 0x2a8   :  { %4587 = vmatpush3.bf16.msra.mxu1 %v5419_v54 }
 0x2a9   :  { %4588 = vmatprep.subr.bf16.mxu1 %v5420_v55 }
 0x2ac   :  { %4589 = vmatpush3.bf16.msra.mxu1 %v5421_v56 }
 0x2ad   :  { %4590 = vmatprep.subr.bf16.mxu1 %v5422_v57 }
 0x2b0   :  { %4591 = vmatpush3.bf16.msra.mxu1 %v5423_v58 }
 0x2b1   :  { %4592 = vmatprep.subr.bf16.mxu1 %v5424_v59 }
 0x2b4   :  { %4593 = vmatpush3.bf16.msra.mxu1 %v5425_v43 }
 0x2b5   :  { %4594 = vmatprep.subr.bf16.mxu1 %v5426_v44 }
 0x2b8   :  { %4595 = vmatpush3.bf16.msra.mxu1 %v5427_v60 }
 0x2b9   :  { %4602 = vmatprep.subr.bf16.mxu1 %v5428_v61 }
 0x36e   :  { %v3564_v2 = vpop.f32.mrb[8].mxu1  ;;  %v3687_v3 = vpop.f32.mrb[8].mxu0 }
 0x36f   :  { %v4632_v4 = vadd.f32 %v3564_v2, %v2471_v63  ;;  %v3566_v5 = vpop.f32.mrb[9].mxu1  ;;  %v3689_v8 = vpop.f32.mrb[9].mxu0  ;;  %v4634_v7 = vadd.f32 %v3687_v3, %v2479_v6 }
 0x370   :  { %v4633_v9 = vadd.f32 %v3566_v5, %v2475_v0  ;;  %v4635_v10 = vadd.f32 %v3689_v8, %v2483_v1  ;;  %v3568_v11 = vpop.f32.mrb[10].mxu1  ;;  %v3691_v12 = vpop.f32.mrb[10].mxu0 }
 0x371   :  { %v3569_v13 = vpop.f32.mrb[11].mxu1  ;;  %v3692_v15 = vpop.f32.mrb[11].mxu0  ;;  %v3694_v35 = vpack.c.bf16 %v4632_v4, %v4632_v4  ;;  %v3696_v33 = vpack.c.bf16 %v4634_v7, %v4634_v7 }
 0x372   :  { %v3695_v16 = vpack.c.bf16 %v4633_v9, %v4633_v9  ;;  %v3697_v21 = vpack.c.bf16 %v4635_v10, %v4635_v10 }
 0x374   :  { %3993 = vmatprep.mubr.bf16.mxu1 %v3695_v16 }
 0x375   :  { %3994 = vmatmul.mubr.bf16.vlgmr.msra.gmra.mrb[12].mxu1 %v3694_v35 }
 0x376   :  { %4603 = vmatpush3.bf16.msra.mxu1 %v5429_v19  ;;  %4033 = vmatprep.mubr.bf16.mxu1 %v3697_v21 }
 0x377   :  { %4604 = vmatprep.subr.bf16.mxu1 %v5430_v20 }
 0x37a   :  { %4605 = vmatpush3.bf16.msra.mxu1 %v5431_v14 }
 0x37b   :  { %4606 = vmatprep.subr.bf16.mxu1 %v5432_v18 }
 0x37e   :  { %4607 = vmatpush3.bf16.msra.mxu1 %v5433_v22 }
 0x37f   :  { %4608 = vmatprep.subr.bf16.mxu1 %v5434_v23 }
 0x382   :  { %4609 = vmatpush3.bf16.msra.mxu1 %v5435_v24 }
 0x383   :  { %4610 = vmatprep.subr.bf16.mxu1 %v5436_v25 }
 0x386   :  { %4611 = vmatpush3.bf16.msra.mxu1 %v5437_v26 }
 0x387   :  { %4612 = vmatprep.subr.bf16.mxu1 %v5438_v27 }
 0x38a   :  { %4613 = vmatpush3.bf16.msra.mxu1 %v5439_v28 }
 0x38b   :  { %4614 = vmatprep.subr.bf16.mxu1 %v5440_v29 }
 0x38e   :  { %4615 = vmatpush3.bf16.msra.mxu1 %v5441_v30 }
 0x38f   :  { %4616 = vmatprep.subr.bf16.mxu1 %v5442_v31 }
 0x392   :  { %4617 = vmatpush3.bf16.msra.mxu1 %v5443_v47 }
 0x395   :  { %4034 = vmatmul.mubr.bf16.vlgmr.msra.gmra.mrb[16].mxu1 %v3696_v33 }
 0x448   :  { %v4596_v36 = vpop.f32.mrb[12].mxu1 }
 0x449   :  { %v4597_v37 = vpop.f32.mrb[13].mxu1 }
 0x44a   :  { %v4598_v34 = vadd.f32 %v4597_v37, %v4596_v36  ;;  %v4599_v38 = vpop.f32.mrb[14].mxu1 }
 0x44b   :  { %v4600_v39 = vpop.f32.mrb[15].mxu1 }
 0x44c   :  { %v3996_v45 = vadd.f32 %v4598_v34, %v4547_v40 }
 0x468   :  { %v4618_v41 = vpop.f32.mrb[16].mxu1 }
 0x469   :  { %v4619_v42 = vpop.f32.mrb[17].mxu1 }
 0x46a   :  { %v4620_v32 = vadd.f32 %v4619_v42, %v4618_v41  ;;  %v4621_v17 = vpop.f32.mrb[18].mxu1 }
 0x46b   :  { %v4622_v46 = vpop.f32.mrb[19].mxu1 }
 0x46c   :  { %v4036_v48 = vadd.f32 %v4620_v32, %v3996_v45 }
 0x46e   :  { %5444 = vtanh.f32 %v4036_v48 }
 0x478   :  { %v5445_v51 = vpop.eup %5444 }
 0x479   :  { %4042 = vst [vmem:[#allocation14] sm:$0xff] %v5445_v51 }
 0x47a   :  { %5611 = shalt.err (!%p5608_p4)
}
 0x47b   :  { %s5612_s15 = scalar_lea.hbm %s5867_s7, 128 }
 0x47c   :  { %p5613_p5 = scmp.ne.s32.totalorder %s5867_s7, %s5612_s15  ;;  %p5616_p6 = scmp.lt.u32.totalorder %s5612_s15, %s5867_s7 }
 0x47e   :  { %p5618_p7 = pnand %p5616_p6, %p5613_p5 }
 0x480   :  { %5621 = shalt.err (!%p5618_p7)
}
 0x481   :  { %4052 = dma.vmem_to_hbm [thread:$0]  %s4050_s13, 128, %s5867_s7, [#allocation4]  }
 0x482   :  { %5630 = dma.done.wait [#allocation4], 128  }
 0x483   :  { %5631 = vsyncadd [#allocation4], 4294967168 }
 0x484   :  { %4056 = vsyncpa [#allocation3], 1 }
 0x485   :  { %4057 = vsyncpa [#allocation6], 1 }
 0x486   :  { %4058 = vsyncpa [#allocation9], 1 }
 0x487   :  { %4059 = vsyncpa [#allocation12], 1 }
 0x488   :  { %4060 = vsyncpa [#allocation4], 1 }

</bundles_post_ra>
